<compile_context>
chip_gen: v6e
topology: v6e:2x2x1
jax: 0.10.0
libtpu: 0.0.40
codegen_flags: <defaults>
</compile_context>

<pallas_src>
import math
import numpy as np
import jax
import jax.numpy as jnp
from jax.experimental import pallas as pl
from jax.experimental.pallas import tpu as pltpu

INPUT_DIM = 16
D_MODEL = 64
D_FF = 2048
D_OUT = 32
OUT_PAD = 128            # lane-dense output width (sliced back to D_OUT in the wrapper)
LN_EPS = 1e-5


def _round_up(a, m):
    return (a + m - 1) // m * m


def _transformer_kernel(x_ref, xlast_ref, bpe_ref, bkv_ref,
                        wenc_ref, wxkv_ref, wq_ref, wo_ref,
                        w1_ref, b1_ref, w2_ref, wdec_ref, pvec_ref,
                        out_ref):
    Bt, S, Din = x_ref.shape
    D = wenc_ref.shape[1]
    n_ff = w1_ref.shape[0]
    scale = 1.0 / math.sqrt(D)

    # ---- packed per-channel vectors: one (8,128) f32 stream instead of 8 tiny ones ----
    pvec = pvec_ref[...]
    bq_pad = pvec[0:1, :]            # (1, 128), last 64 lanes are zero
    bo     = pvec[1:2, :D]
    ln1_g  = pvec[2:3, :D]
    ln1_b  = pvec[3:4, :D]
    b2     = pvec[4:5, :D]
    ln2_g  = pvec[5:6, :D]
    ln2_b  = pvec[6:7, :D]
    b_dec  = pvec[7:8, :]            # (1, 128), lanes >= D_OUT are zero

    # ---- fused K|V for every token, directly from x (encoder weight folded in wrapper) ----
    x_flat = x_ref[...].reshape(Bt * S, Din).astype(jnp.bfloat16)
    kv = jnp.dot(x_flat, wxkv_ref[...],
                 preferred_element_type=jnp.float32).reshape(Bt, S, 2 * D)
    kv = kv + bkv_ref[...]                                        # (Bt,S,2D) + (Bt,1,2D)

    # ---- last-token hidden state (residual stream) and zero-padded query ----
    h_last = jnp.dot(xlast_ref[...].astype(jnp.bfloat16), wenc_ref[...],
                     preferred_element_type=jnp.float32) + bpe_ref[...]       # (Bt, D)
    q_pad = jnp.dot(h_last.astype(jnp.bfloat16), wq_ref[...],
                    preferred_element_type=jnp.float32) + bq_pad              # (Bt, 2D)

    # ---- single-head attention, last query only: VPU broadcast-mul + reduce ----
    # (no degenerate M=1 batched matmuls; q_pad's upper 64 lanes are zero so q_pad.kv = q.k)
    scores = jnp.sum(q_pad[:, None, :] * kv, axis=-1) * scale                 # (Bt, S)
    scores = scores - jnp.max(scores, axis=-1, keepdims=True)
    p = jnp.exp(scores)
    p = p * pl.reciprocal(jnp.sum(p, axis=-1, keepdims=True), approx=True)
    attn_kv = jnp.sum(p[:, :, None] * kv, axis=1)                             # (Bt, 2D)
    # wo_ref has its first D rows zeroed, so the p.K half of attn_kv is ignored.
    attn = jnp.dot(attn_kv.astype(jnp.bfloat16), wo_ref[...],
                   preferred_element_type=jnp.float32) + bo                   # (Bt, D)

    # ---- residual + LayerNorm1 (last token only) ----
    y = h_last + attn
    mu = jnp.mean(y, axis=-1, keepdims=True)
    var = jnp.mean((y - mu) ** 2, axis=-1, keepdims=True)
    y = (y - mu) * jax.lax.rsqrt(var + LN_EPS) * ln1_g + ln1_b

    # ---- feed-forward, chunked over D_FF (no (Bt, D_FF) f32 intermediate kept live) ----
    y_bf = y.astype(jnp.bfloat16)

    def ff_step(c, acc):
        f = jnp.dot(y_bf, w1_ref[c], preferred_element_type=jnp.float32) + b1_ref[c]
        f = jnp.maximum(f, 0.0).astype(jnp.bfloat16)
        return acc + jnp.dot(f, w2_ref[c], preferred_element_type=jnp.float32)

    ff = jax.lax.fori_loop(0, n_ff, ff_step,
                           jnp.zeros((Bt, D), jnp.float32), unroll=True)
    ff = ff + b2

    # ---- residual + LayerNorm2 ----
    y = y + ff
    mu = jnp.mean(y, axis=-1, keepdims=True)
    var = jnp.mean((y - mu) ** 2, axis=-1, keepdims=True)
    y = (y - mu) * jax.lax.rsqrt(var + LN_EPS) * ln2_g + ln2_b

    # ---- decoder Linear; 128-lane padded weight -> one unmasked, lane-dense store ----
    out_ref[...] = jnp.dot(y.astype(jnp.bfloat16), wdec_ref[...],
                           preferred_element_type=jnp.float32) + b_dec


def transformer_forward(x, params, block_batch=256, ff_chunk=512):
    """x: (B, S, INPUT_DIM) float32 -> (B, D_OUT) float32."""
    B, S, Din = x.shape
    assert Din == INPUT_DIM and D_FF % ff_chunk == 0
    f32, bf16 = jnp.float32, jnp.bfloat16
    n_ck = D_FF // ff_chunk

    # -------- wrapper-side weight prep (f32 math, bf16 casts for MXU operands) --------
    # Per-sample encoder bias + positional-encoding row (module broadcasts pe[b] over seq).
    bpe = (params["pe"][:, 0, :] + params["b_enc"]).astype(f32)                 # (B, D)

    w_in, b_in = params["w_in"], params["b_in"]
    wq, wk, wv = w_in[:, :D_MODEL], w_in[:, D_MODEL:2 * D_MODEL], w_in[:, 2 * D_MODEL:]
    bq, bk, bv = b_in[:, :D_MODEL], b_in[:, D_MODEL:2 * D_MODEL], b_in[:, 2 * D_MODEL:]

    # Fuse K|V and fold the encoder weight/bias into them.
    wkv = jnp.concatenate([wk, wv], axis=1)                                     # (D, 2D)
    w_xkv = (params["w_enc"] @ wkv).astype(bf16)                                # (Din, 2D)
    b_kv = (bpe @ wkv + jnp.concatenate([bk, bv], axis=1))[:, None, :]          # (B, 1, 2D)

    # Zero-padded Q / out-proj weights so the fused kv tensor is never lane-sliced in-kernel.
    wq_pad = jnp.concatenate([wq, jnp.zeros_like(wq)], axis=1).astype(bf16)     # (D, 2D)
    bq_pad = jnp.concatenate([bq, jnp.zeros_like(bq)], axis=1).astype(f32)      # (1, 2D)
    wo_pad = jnp.concatenate([jnp.zeros_like(params["w_out"]), params["w_out"]],
                             axis=0).astype(bf16)                               # (2D, D)

    # Feed-forward weights, chunked along D_FF.
    w1c = params["w1"].reshape(D_MODEL, n_ck, ff_chunk).transpose(1, 0, 2).astype(bf16)
    b1c = params["b1"].reshape(1, n_ck, ff_chunk).transpose(1, 0, 2).astype(f32)
    w2c = params["w2"].reshape(n_ck, ff_chunk, D_MODEL).astype(bf16)

    # Decoder padded to 128 lanes -> unmasked lane-dense stores (sliced back below).
    wdec_pad = jnp.pad(params["w_dec"], ((0, 0), (0, OUT_PAD - D_OUT))).astype(bf16)
    bdec_pad = jnp.pad(params["b_dec"], ((0, 0), (0, OUT_PAD - D_OUT))).astype(f32)

    def _row(v):
        return jnp.pad(v.astype(f32), ((0, 0), (0, OUT_PAD - v.shape[1])))
    pvec = jnp.concatenate(
        [bq_pad, _row(params["b_out"]), _row(params["ln1_g"]), _row(params["ln1_b"]),
         _row(params["b2"]), _row(params["ln2_g"]), _row(params["ln2_b"]), bdec_pad],
        axis=0)                                                                 # (8, 128) f32

    w_enc_bf = params["w_enc"].astype(bf16)
    x_last = x[:, -1, :]                                                        # (B, Din)

    # -------- batch tiling: several samples per grid step; keep >=2 steps when B allows so
    #          the "parallel" axis can shard across v7x's two TensorCores. --------
    target = min(block_batch, max(8, _round_up(B, 8) // 2))
    Bt = _round_up(target, 8)
    Bp = _round_up(B, Bt)
    if Bp != B:
        pad = Bp - B
        x = jnp.pad(x, ((0, pad), (0, 0), (0, 0)))
        x_last = jnp.pad(x_last, ((0, pad), (0, 0)))
        bpe = jnp.pad(bpe, ((0, pad), (0, 0)))
        b_kv = jnp.pad(b_kv, ((0, pad), (0, 0), (0, 0)))

    def _rep(shape):   # grid-invariant (weight) block, resident across all steps
        nd = len(shape)
        return pl.BlockSpec(shape, lambda b: (0,) * nd)

    in_specs = [
        pl.BlockSpec((Bt, S, INPUT_DIM), lambda b: (b, 0, 0)),     # x tile
        pl.BlockSpec((Bt, INPUT_DIM), lambda b: (b, 0)),           # last-token x slice
        pl.BlockSpec((Bt, D_MODEL), lambda b: (b, 0)),             # per-sample enc bias + PE
        pl.BlockSpec((Bt, 1, 2 * D_MODEL), lambda b: (b, 0, 0)),   # per-sample folded K|V bias
        _rep((INPUT_DIM, D_MODEL)),                                # W_enc           (bf16)
        _rep((INPUT_DIM, 2 * D_MODEL)),                            # W_enc@[Wk|Wv]   (bf16)
        _rep((D_MODEL, 2 * D_MODEL)),                              # [Wq | 0]        (bf16)
        _rep((2 * D_MODEL, D_MODEL)),                              # [0 ; Wo]        (bf16)
        _rep((n_ck, D_MODEL, ff_chunk)),                           # W1 chunks       (bf16)
        _rep((n_ck, 1, ff_chunk)),                                 # b1 chunks       (f32)
        _rep((n_ck, ff_chunk, D_MODEL)),                           # W2 chunks       (bf16)
        _rep((D_MODEL, OUT_PAD)),                                  # W_dec padded    (bf16)
        _rep((8, OUT_PAD)),                                        # packed small vectors (f32)
    ]

    out = pl.pallas_call(
        _transformer_kernel,
        out_shape=jax.ShapeDtypeStruct((Bp, OUT_PAD), jnp.float32),
        grid_spec=pltpu.PrefetchScalarGridSpec(
            num_scalar_prefetch=0,
            grid=(Bp // Bt,),
            in_specs=in_specs,
            out_specs=pl.BlockSpec((Bt, OUT_PAD), lambda b: (b, 0)),
        ),
        compiler_params=pltpu.CompilerParams(
            dimension_semantics=("parallel",),
        ),
    )(x, x_last, bpe, b_kv,
      w_enc_bf, w_xkv, wq_pad, wo_pad,
      w1c, b1c, w2c, wdec_pad, pvec)
    return out[:B, :D_OUT]


def make_pe(batch, d_model):
    # sinusoidal table rows 0..batch-1 (the module broadcasts these over the sequence)
    position = jnp.arange(batch, dtype=jnp.float32)[:, None]
    div_term = jnp.exp(jnp.arange(0, d_model, 2, dtype=jnp.float32)
                       * (-math.log(10000.0) / d_model))
    pe = jnp.zeros((batch, d_model), dtype=jnp.float32)
    pe = pe.at[:, 0::2].set(jnp.sin(position * div_term))
    pe = pe.at[:, 1::2].set(jnp.cos(position * div_term))
    return pe[:, None, :]                                       # (B, 1, D_MODEL)


def init_params(key, batch):
    ks = jax.random.split(key, 8)
    n = lambda k, shape, s=0.05: (s * jax.random.normal(k, shape)).astype(jnp.float32)
    return {
        "pe":    make_pe(batch, D_MODEL),
        "w_enc": n(ks[0], (INPUT_DIM, D_MODEL)),
        "b_enc": n(ks[1], (1, D_MODEL)),
        "w_in":  n(ks[2], (D_MODEL, 3 * D_MODEL)),
        "b_in":  jnp.zeros((1, 3 * D_MODEL), jnp.float32),
        "w_out": n(ks[3], (D_MODEL, D_MODEL)),
        "b_out": jnp.zeros((1, D_MODEL), jnp.float32),
        "ln1_g": jnp.ones((1, D_MODEL), jnp.float32),
        "ln1_b": jnp.zeros((1, D_MODEL), jnp.float32),
        "w1":    n(ks[4], (D_MODEL, D_FF)),
        "b1":    jnp.zeros((1, D_FF), jnp.float32),
        "w2":    n(ks[5], (D_FF, D_MODEL)),
        "b2":    jnp.zeros((1, D_MODEL), jnp.float32),
        "ln2_g": jnp.ones((1, D_MODEL), jnp.float32),
        "ln2_b": jnp.zeros((1, D_MODEL), jnp.float32),
        "w_dec": n(ks[6], (D_MODEL, D_OUT)),
        "b_dec": n(ks[7], (1, D_OUT)),
    }


def reference_forward(x, p):
    """Pure-JAX f32 mirror of the PyTorch forward (eval mode), full-sequence version."""
    h = x @ p["w_enc"] + p["b_enc"]
    h = h + p["pe"]                                 # (B,1,D) broadcast over seq
    qkv = h @ p["w_in"] + p["b_in"]
    q, k, v = jnp.split(qkv, 3, axis=-1)
    s = jnp.einsum("bqd,bkd->bqk", q, k) / math.sqrt(D_MODEL)
    a = jax.nn.softmax(s, axis=-1)
    attn = jnp.einsum("bqk,bkd->bqd", a, v) @ p["w_out"] + p["b_out"]
    h = h + attn
    h = (h - h.mean(-1, keepdims=True)) * jax.lax.rsqrt(h.var(-1, keepdims=True) + LN_EPS)
    h = h * p["ln1_g"] + p["ln1_b"]
    f = jnp.maximum(h @ p["w1"] + p["b1"], 0.0) @ p["w2"] + p["b2"]
    h = h + f
    h = (h - h.mean(-1, keepdims=True)) * jax.lax.rsqrt(h.var(-1, keepdims=True) + LN_EPS)
    h = h * p["ln2_g"] + p["ln2_b"]
    return h[:, -1, :] @ p["w_dec"] + p["b_dec"]


if __name__ == "__main__":
    B, S = 16, 8
    key = jax.random.PRNGKey(0)
    kx, kp = jax.random.split(key)
    x = jax.random.normal(kx, (B, S, INPUT_DIM), dtype=jnp.float32)
    params = init_params(kp, B)

    # Auto batch tiling gives Bt=8 -> 2 grid steps here (exercises the parallel batch axis).
    out = transformer_forward(x, params)
    out = jax.block_until_ready(out)

    ref = jax.block_until_ready(reference_forward(x, params))
    assert out.shape == (B, D_OUT)
    # bf16 MXU operands (with f32 accumulation) + approx softmax reciprocal vs. the pure-f32
    # reference -> tolerance widened accordingly (typical end-to-end error is a few 1e-3).
    np.testing.assert_allclose(np.asarray(out), np.asarray(ref), rtol=2e-2, atol=2e-2)

    print("KERNEL_OK")
</pallas_src>

<mosaic_0001>
module attributes {stable_mosaic.version = 11 : i64} {
  func.func @_transformer_kernel(%arg0: i32, %arg1: memref<8x8x16xf32, #tpu.memory_space<vmem>>, %arg2: memref<8x16xf32, #tpu.memory_space<vmem>>, %arg3: memref<8x64xf32, #tpu.memory_space<vmem>>, %arg4: memref<8x1x128xf32, #tpu.memory_space<vmem>>, %arg5: memref<16x64xbf16, #tpu.memory_space<vmem>>, %arg6: memref<16x128xbf16, #tpu.memory_space<vmem>>, %arg7: memref<64x128xbf16, #tpu.memory_space<vmem>>, %arg8: memref<128x64xbf16, #tpu.memory_space<vmem>>, %arg9: memref<4x64x512xbf16, #tpu.memory_space<vmem>>, %arg10: memref<4x1x512xf32, #tpu.memory_space<vmem>>, %arg11: memref<4x512x64xbf16, #tpu.memory_space<vmem>>, %arg12: memref<64x128xbf16, #tpu.memory_space<vmem>>, %arg13: memref<8x128xf32, #tpu.memory_space<vmem>>, %arg14: memref<8x128xf32, #tpu.memory_space<vmem>>) attributes {dimension_semantics = [#tpu.dimension_semantics<parallel>], iteration_bounds = array<i64: 2>, scalar_prefetch = 0 : i64, scratch_operands = 0 : i64, tpu.core_type = #tpu.core_type<tc>, window_params = [{transform_indices = @transform_0, window_bounds = array<i64: 8, 8, 16>}, {transform_indices = @transform_1, window_bounds = array<i64: 8, 16>}, {transform_indices = @transform_2, window_bounds = array<i64: 8, 64>}, {transform_indices = @transform_3, window_bounds = array<i64: 8, 1, 128>}, {pipeline_mode = #tpu.pipeline_mode<synchronous>, transform_indices = @transform_4, window_bounds = array<i64: 16, 64>}, {pipeline_mode = #tpu.pipeline_mode<synchronous>, transform_indices = @transform_5, window_bounds = array<i64: 16, 128>}, {pipeline_mode = #tpu.pipeline_mode<synchronous>, transform_indices = @transform_6, window_bounds = array<i64: 64, 128>}, {pipeline_mode = #tpu.pipeline_mode<synchronous>, transform_indices = @transform_7, window_bounds = array<i64: 128, 64>}, {pipeline_mode = #tpu.pipeline_mode<synchronous>, transform_indices = @transform_8, window_bounds = array<i64: 4, 64, 512>}, {pipeline_mode = #tpu.pipeline_mode<synchronous>, transform_indices = @transform_9, window_bounds = array<i64: 4, 1, 512>}, {pipeline_mode = #tpu.pipeline_mode<synchronous>, transform_indices = @transform_10, window_bounds = array<i64: 4, 512, 64>}, {pipeline_mode = #tpu.pipeline_mode<synchronous>, transform_indices = @transform_11, window_bounds = array<i64: 64, 128>}, {pipeline_mode = #tpu.pipeline_mode<synchronous>, transform_indices = @transform_12, window_bounds = array<i64: 8, 128>}, {transform_indices = @transform_13, window_bounds = array<i64: 8, 128>}]} {
    %c0 = arith.constant 0 : index
    %c0_0 = arith.constant 0 : index
    %0 = vector.load %arg13[%c0, %c0_0] : memref<8x128xf32, #tpu.memory_space<vmem>>, vector<8x128xf32>
    %1 = vector.extract_strided_slice %0 {offsets = [0, 0], sizes = [1, 128], strides = [1, 1]} : vector<8x128xf32> to vector<1x128xf32>
    %2 = vector.extract_strided_slice %0 {offsets = [1, 0], sizes = [1, 64], strides = [1, 1]} : vector<8x128xf32> to vector<1x64xf32>
    %3 = vector.extract_strided_slice %0 {offsets = [2, 0], sizes = [1, 64], strides = [1, 1]} : vector<8x128xf32> to vector<1x64xf32>
    %4 = vector.extract_strided_slice %0 {offsets = [3, 0], sizes = [1, 64], strides = [1, 1]} : vector<8x128xf32> to vector<1x64xf32>
    %5 = vector.extract_strided_slice %0 {offsets = [4, 0], sizes = [1, 64], strides = [1, 1]} : vector<8x128xf32> to vector<1x64xf32>
    %6 = vector.extract_strided_slice %0 {offsets = [5, 0], sizes = [1, 64], strides = [1, 1]} : vector<8x128xf32> to vector<1x64xf32>
    %7 = vector.extract_strided_slice %0 {offsets = [6, 0], sizes = [1, 64], strides = [1, 1]} : vector<8x128xf32> to vector<1x64xf32>
    %8 = vector.extract_strided_slice %0 {offsets = [7, 0], sizes = [1, 128], strides = [1, 1]} : vector<8x128xf32> to vector<1x128xf32>
    %c0_1 = arith.constant 0 : index
    %c0_2 = arith.constant 0 : index
    %c0_3 = arith.constant 0 : index
    %9 = vector.load %arg1[%c0_1, %c0_2, %c0_3] : memref<8x8x16xf32, #tpu.memory_space<vmem>>, vector<8x8x16xf32>
    %10 = vector.shape_cast %9 : vector<8x8x16xf32> to vector<64x16xf32>
    %11 = arith.truncf %10 : vector<64x16xf32> to vector<64x16xbf16>
    %c0_4 = arith.constant 0 : index
    %c0_5 = arith.constant 0 : index
    %12 = vector.load %arg6[%c0_4, %c0_5] : memref<16x128xbf16, #tpu.memory_space<vmem>>, vector<16x128xbf16>
    %cst = arith.constant dense<0.000000e+00> : vector<64x128xf32>
    %13 = tpu.matmul %11, %12, %cst {dimension_numbers = #tpu.dot_dimension_numbers<[1], [0], [0], [1], [0, 0, 1, 1], [], []>} : vector<64x16xbf16>, vector<16x128xbf16>, vector<64x128xf32> -> vector<64x128xf32>
    %14 = vector.shape_cast %13 : vector<64x128xf32> to vector<8x8x128xf32>
    %c0_6 = arith.constant 0 : index
    %c0_7 = arith.constant 0 : index
    %c0_8 = arith.constant 0 : index
    %15 = vector.load %arg4[%c0_6, %c0_7, %c0_8] : memref<8x1x128xf32, #tpu.memory_space<vmem>>, vector<8x1x128xf32>
    %16 = vector.broadcast %15 : vector<8x1x128xf32> to vector<8x8x128xf32>
    %17 = arith.addf %14, %16 : vector<8x8x128xf32>
    %c0_9 = arith.constant 0 : index
    %c0_10 = arith.constant 0 : index
    %18 = vector.load %arg2[%c0_9, %c0_10] : memref<8x16xf32, #tpu.memory_space<vmem>>, vector<8x16xf32>
    %19 = arith.truncf %18 : vector<8x16xf32> to vector<8x16xbf16>
    %c0_11 = arith.constant 0 : index
    %c0_12 = arith.constant 0 : index
    %20 = vector.load %arg5[%c0_11, %c0_12] : memref<16x64xbf16, #tpu.memory_space<vmem>>, vector<16x64xbf16>
    %cst_13 = arith.constant dense<0.000000e+00> : vector<8x64xf32>
    %21 = tpu.matmul %19, %20, %cst_13 {dimension_numbers = #tpu.dot_dimension_numbers<[1], [0], [0], [1], [0, 0, 1, 1], [], []>} : vector<8x16xbf16>, vector<16x64xbf16>, vector<8x64xf32> -> vector<8x64xf32>
    %c0_14 = arith.constant 0 : index
    %c0_15 = arith.constant 0 : index
    %22 = vector.load %arg3[%c0_14, %c0_15] : memref<8x64xf32, #tpu.memory_space<vmem>>, vector<8x64xf32>
    %23 = arith.addf %21, %22 : vector<8x64xf32>
    %24 = arith.truncf %23 : vector<8x64xf32> to vector<8x64xbf16>
    %c0_16 = arith.constant 0 : index
    %c0_17 = arith.constant 0 : index
    %25 = vector.load %arg7[%c0_16, %c0_17] : memref<64x128xbf16, #tpu.memory_space<vmem>>, vector<64x128xbf16>
    %cst_18 = arith.constant dense<0.000000e+00> : vector<8x128xf32>
    %26 = tpu.matmul %24, %25, %cst_18 {dimension_numbers = #tpu.dot_dimension_numbers<[1], [0], [0], [1], [0, 0, 1, 1], [], []>} : vector<8x64xbf16>, vector<64x128xbf16>, vector<8x128xf32> -> vector<8x128xf32>
    %27 = vector.broadcast %1 : vector<1x128xf32> to vector<8x128xf32>
    %28 = arith.addf %26, %27 : vector<8x128xf32>
    %29 = vector.shape_cast %28 : vector<8x128xf32> to vector<8x1x128xf32>
    %30 = vector.broadcast %29 : vector<8x1x128xf32> to vector<8x8x128xf32>
    %31 = arith.mulf %30, %17 : vector<8x8x128xf32>
    %cst_19 = arith.constant dense<0.000000e+00> : vector<8x8xf32>
    %32 = vector.multi_reduction <add>, %31, %cst_19 [2] : vector<8x8x128xf32> to vector<8x8xf32>
    %cst_20 = arith.constant 1.250000e-01 : f32
    %33 = vector.broadcast %cst_20 : f32 to vector<8x8xf32>
    %34 = arith.mulf %32, %33 : vector<8x8xf32>
    %cst_21 = arith.constant dense<0xFF800000> : vector<8xf32>
    %35 = vector.multi_reduction <maximumf>, %34, %cst_21 [1] : vector<8x8xf32> to vector<8xf32>
    %36 = vector.shape_cast %35 : vector<8xf32> to vector<8x1xf32>
    %37 = vector.broadcast %36 : vector<8x1xf32> to vector<8x8xf32>
    %38 = arith.subf %34, %37 : vector<8x8xf32>
    %39 = math.exp %38 : vector<8x8xf32>
    %cst_22 = arith.constant dense<0.000000e+00> : vector<8xf32>
    %40 = vector.multi_reduction <add>, %39, %cst_22 [1] : vector<8x8xf32> to vector<8xf32>
    %41 = vector.shape_cast %40 : vector<8xf32> to vector<8x1xf32>
    %42 = tpu.reciprocal %41 {approx = true} : vector<8x1xf32> -> vector<8x1xf32>
    %43 = vector.broadcast %42 : vector<8x1xf32> to vector<8x8xf32>
    %44 = arith.mulf %39, %43 : vector<8x8xf32>
    %45 = vector.shape_cast %44 : vector<8x8xf32> to vector<8x8x1xf32>
    %46 = vector.broadcast %45 : vector<8x8x1xf32> to vector<8x8x128xf32>
    %47 = arith.mulf %46, %17 : vector<8x8x128xf32>
    %cst_23 = arith.constant dense<0.000000e+00> : vector<8x128xf32>
    %48 = vector.multi_reduction <add>, %47, %cst_23 [1] : vector<8x8x128xf32> to vector<8x128xf32>
    %49 = arith.truncf %48 : vector<8x128xf32> to vector<8x128xbf16>
    %c0_24 = arith.constant 0 : index
    %c0_25 = arith.constant 0 : index
    %50 = vector.load %arg8[%c0_24, %c0_25] : memref<128x64xbf16, #tpu.memory_space<vmem>>, vector<128x64xbf16>
    %cst_26 = arith.constant dense<0.000000e+00> : vector<8x64xf32>
    %51 = tpu.matmul %49, %50, %cst_26 {dimension_numbers = #tpu.dot_dimension_numbers<[1], [0], [0], [1], [0, 0, 1, 1], [], []>} : vector<8x128xbf16>, vector<128x64xbf16>, vector<8x64xf32> -> vector<8x64xf32>
    %52 = vector.broadcast %2 : vector<1x64xf32> to vector<8x64xf32>
    %53 = arith.addf %51, %52 : vector<8x64xf32>
    %54 = arith.addf %23, %53 : vector<8x64xf32>
    %cst_27 = arith.constant dense<0.000000e+00> : vector<8xf32>
    %55 = vector.multi_reduction <add>, %54, %cst_27 [1] : vector<8x64xf32> to vector<8xf32>
    %56 = vector.shape_cast %55 : vector<8xf32> to vector<8x1xf32>
    %cst_28 = arith.constant 6.400000e+01 : f32
    %57 = vector.broadcast %cst_28 : f32 to vector<8x1xf32>
    %58 = arith.divf %56, %57 : vector<8x1xf32>
    %59 = vector.broadcast %58 : vector<8x1xf32> to vector<8x64xf32>
    %60 = arith.subf %54, %59 : vector<8x64xf32>
    %61 = arith.mulf %60, %60 : vector<8x64xf32>
    %cst_29 = arith.constant dense<0.000000e+00> : vector<8xf32>
    %62 = vector.multi_reduction <add>, %61, %cst_29 [1] : vector<8x64xf32> to vector<8xf32>
    %63 = vector.shape_cast %62 : vector<8xf32> to vector<8x1xf32>
    %cst_30 = arith.constant 6.400000e+01 : f32
    %64 = vector.broadcast %cst_30 : f32 to vector<8x1xf32>
    %65 = arith.divf %63, %64 : vector<8x1xf32>
    %66 = vector.broadcast %58 : vector<8x1xf32> to vector<8x64xf32>
    %67 = arith.subf %54, %66 : vector<8x64xf32>
    %cst_31 = arith.constant 9.99999974E-6 : f32
    %68 = vector.broadcast %cst_31 : f32 to vector<8x1xf32>
    %69 = arith.addf %65, %68 : vector<8x1xf32>
    %70 = math.rsqrt %69 : vector<8x1xf32>
    %71 = vector.broadcast %70 : vector<8x1xf32> to vector<8x64xf32>
    %72 = arith.mulf %67, %71 : vector<8x64xf32>
    %73 = vector.broadcast %3 : vector<1x64xf32> to vector<8x64xf32>
    %74 = arith.mulf %72, %73 : vector<8x64xf32>
    %75 = vector.broadcast %4 : vector<1x64xf32> to vector<8x64xf32>
    %76 = arith.addf %74, %75 : vector<8x64xf32>
    %77 = arith.truncf %76 : vector<8x64xf32> to vector<8x64xbf16>
    %cst_32 = arith.constant 0.000000e+00 : f32
    %78 = vector.broadcast %cst_32 : f32 to vector<8x64xf32>
    %c0_i32 = arith.constant 0 : i32
    %79 = arith.index_cast %c0_i32 : i32 to index
    %c0_33 = arith.constant 0 : index
    %c0_34 = arith.constant 0 : index
    %80 = vector.load %arg9[%79, %c0_33, %c0_34] : memref<4x64x512xbf16, #tpu.memory_space<vmem>>, vector<1x64x512xbf16>
    %81 = vector.shape_cast %80 : vector<1x64x512xbf16> to vector<64x512xbf16>
    %cst_35 = arith.constant dense<0.000000e+00> : vector<8x512xf32>
    %82 = tpu.matmul %77, %81, %cst_35 {dimension_numbers = #tpu.dot_dimension_numbers<[1], [0], [0], [1], [0, 0, 1, 1], [], []>} : vector<8x64xbf16>, vector<64x512xbf16>, vector<8x512xf32> -> vector<8x512xf32>
    %83 = arith.index_cast %c0_i32 : i32 to index
    %c0_36 = arith.constant 0 : index
    %c0_37 = arith.constant 0 : index
    %84 = vector.load %arg10[%83, %c0_36, %c0_37] : memref<4x1x512xf32, #tpu.memory_space<vmem>>, vector<1x1x512xf32>
    %85 = vector.shape_cast %84 : vector<1x1x512xf32> to vector<1x512xf32>
    %86 = vector.broadcast %85 : vector<1x512xf32> to vector<8x512xf32>
    %87 = arith.addf %82, %86 : vector<8x512xf32>
    %cst_38 = arith.constant 0.000000e+00 : f32
    %88 = vector.broadcast %cst_38 : f32 to vector<8x512xf32>
    %89 = arith.maximumf %87, %88 : vector<8x512xf32>
    %90 = arith.truncf %89 : vector<8x512xf32> to vector<8x512xbf16>
    %91 = arith.index_cast %c0_i32 : i32 to index
    %c0_39 = arith.constant 0 : index
    %c0_40 = arith.constant 0 : index
    %92 = vector.load %arg11[%91, %c0_39, %c0_40] : memref<4x512x64xbf16, #tpu.memory_space<vmem>>, vector<1x512x64xbf16>
    %93 = vector.shape_cast %92 : vector<1x512x64xbf16> to vector<512x64xbf16>
    %cst_41 = arith.constant dense<0.000000e+00> : vector<8x64xf32>
    %94 = tpu.matmul %90, %93, %cst_41 {dimension_numbers = #tpu.dot_dimension_numbers<[1], [0], [0], [1], [0, 0, 1, 1], [], []>} : vector<8x512xbf16>, vector<512x64xbf16>, vector<8x64xf32> -> vector<8x64xf32>
    %95 = arith.addf %78, %94 : vector<8x64xf32>
    %c1_i32 = arith.constant 1 : i32
    %96 = arith.index_cast %c1_i32 : i32 to index
    %c0_42 = arith.constant 0 : index
    %c0_43 = arith.constant 0 : index
    %97 = vector.load %arg9[%96, %c0_42, %c0_43] : memref<4x64x512xbf16, #tpu.memory_space<vmem>>, vector<1x64x512xbf16>
    %98 = vector.shape_cast %97 : vector<1x64x512xbf16> to vector<64x512xbf16>
    %cst_44 = arith.constant dense<0.000000e+00> : vector<8x512xf32>
    %99 = tpu.matmul %77, %98, %cst_44 {dimension_numbers = #tpu.dot_dimension_numbers<[1], [0], [0], [1], [0, 0, 1, 1], [], []>} : vector<8x64xbf16>, vector<64x512xbf16>, vector<8x512xf32> -> vector<8x512xf32>
    %100 = arith.index_cast %c1_i32 : i32 to index
    %c0_45 = arith.constant 0 : index
    %c0_46 = arith.constant 0 : index
    %101 = vector.load %arg10[%100, %c0_45, %c0_46] : memref<4x1x512xf32, #tpu.memory_space<vmem>>, vector<1x1x512xf32>
    %102 = vector.shape_cast %101 : vector<1x1x512xf32> to vector<1x512xf32>
    %103 = vector.broadcast %102 : vector<1x512xf32> to vector<8x512xf32>
    %104 = arith.addf %99, %103 : vector<8x512xf32>
    %cst_47 = arith.constant 0.000000e+00 : f32
    %105 = vector.broadcast %cst_47 : f32 to vector<8x512xf32>
    %106 = arith.maximumf %104, %105 : vector<8x512xf32>
    %107 = arith.truncf %106 : vector<8x512xf32> to vector<8x512xbf16>
    %108 = arith.index_cast %c1_i32 : i32 to index
    %c0_48 = arith.constant 0 : index
    %c0_49 = arith.constant 0 : index
    %109 = vector.load %arg11[%108, %c0_48, %c0_49] : memref<4x512x64xbf16, #tpu.memory_space<vmem>>, vector<1x512x64xbf16>
    %110 = vector.shape_cast %109 : vector<1x512x64xbf16> to vector<512x64xbf16>
    %cst_50 = arith.constant dense<0.000000e+00> : vector<8x64xf32>
    %111 = tpu.matmul %107, %110, %cst_50 {dimension_numbers = #tpu.dot_dimension_numbers<[1], [0], [0], [1], [0, 0, 1, 1], [], []>} : vector<8x512xbf16>, vector<512x64xbf16>, vector<8x64xf32> -> vector<8x64xf32>
    %112 = arith.addf %95, %111 : vector<8x64xf32>
    %c2_i32 = arith.constant 2 : i32
    %113 = arith.index_cast %c2_i32 : i32 to index
    %c0_51 = arith.constant 0 : index
    %c0_52 = arith.constant 0 : index
    %114 = vector.load %arg9[%113, %c0_51, %c0_52] : memref<4x64x512xbf16, #tpu.memory_space<vmem>>, vector<1x64x512xbf16>
    %115 = vector.shape_cast %114 : vector<1x64x512xbf16> to vector<64x512xbf16>
    %cst_53 = arith.constant dense<0.000000e+00> : vector<8x512xf32>
    %116 = tpu.matmul %77, %115, %cst_53 {dimension_numbers = #tpu.dot_dimension_numbers<[1], [0], [0], [1], [0, 0, 1, 1], [], []>} : vector<8x64xbf16>, vector<64x512xbf16>, vector<8x512xf32> -> vector<8x512xf32>
    %117 = arith.index_cast %c2_i32 : i32 to index
    %c0_54 = arith.constant 0 : index
    %c0_55 = arith.constant 0 : index
    %118 = vector.load %arg10[%117, %c0_54, %c0_55] : memref<4x1x512xf32, #tpu.memory_space<vmem>>, vector<1x1x512xf32>
    %119 = vector.shape_cast %118 : vector<1x1x512xf32> to vector<1x512xf32>
    %120 = vector.broadcast %119 : vector<1x512xf32> to vector<8x512xf32>
    %121 = arith.addf %116, %120 : vector<8x512xf32>
    %cst_56 = arith.constant 0.000000e+00 : f32
    %122 = vector.broadcast %cst_56 : f32 to vector<8x512xf32>
    %123 = arith.maximumf %121, %122 : vector<8x512xf32>
    %124 = arith.truncf %123 : vector<8x512xf32> to vector<8x512xbf16>
    %125 = arith.index_cast %c2_i32 : i32 to index
    %c0_57 = arith.constant 0 : index
    %c0_58 = arith.constant 0 : index
    %126 = vector.load %arg11[%125, %c0_57, %c0_58] : memref<4x512x64xbf16, #tpu.memory_space<vmem>>, vector<1x512x64xbf16>
    %127 = vector.shape_cast %126 : vector<1x512x64xbf16> to vector<512x64xbf16>
    %cst_59 = arith.constant dense<0.000000e+00> : vector<8x64xf32>
    %128 = tpu.matmul %124, %127, %cst_59 {dimension_numbers = #tpu.dot_dimension_numbers<[1], [0], [0], [1], [0, 0, 1, 1], [], []>} : vector<8x512xbf16>, vector<512x64xbf16>, vector<8x64xf32> -> vector<8x64xf32>
    %129 = arith.addf %112, %128 : vector<8x64xf32>
    %c3_i32 = arith.constant 3 : i32
    %130 = arith.index_cast %c3_i32 : i32 to index
    %c0_60 = arith.constant 0 : index
    %c0_61 = arith.constant 0 : index
    %131 = vector.load %arg9[%130, %c0_60, %c0_61] : memref<4x64x512xbf16, #tpu.memory_space<vmem>>, vector<1x64x512xbf16>
    %132 = vector.shape_cast %131 : vector<1x64x512xbf16> to vector<64x512xbf16>
    %cst_62 = arith.constant dense<0.000000e+00> : vector<8x512xf32>
    %133 = tpu.matmul %77, %132, %cst_62 {dimension_numbers = #tpu.dot_dimension_numbers<[1], [0], [0], [1], [0, 0, 1, 1], [], []>} : vector<8x64xbf16>, vector<64x512xbf16>, vector<8x512xf32> -> vector<8x512xf32>
    %134 = arith.index_cast %c3_i32 : i32 to index
    %c0_63 = arith.constant 0 : index
    %c0_64 = arith.constant 0 : index
    %135 = vector.load %arg10[%134, %c0_63, %c0_64] : memref<4x1x512xf32, #tpu.memory_space<vmem>>, vector<1x1x512xf32>
    %136 = vector.shape_cast %135 : vector<1x1x512xf32> to vector<1x512xf32>
    %137 = vector.broadcast %136 : vector<1x512xf32> to vector<8x512xf32>
    %138 = arith.addf %133, %137 : vector<8x512xf32>
    %cst_65 = arith.constant 0.000000e+00 : f32
    %139 = vector.broadcast %cst_65 : f32 to vector<8x512xf32>
    %140 = arith.maximumf %138, %139 : vector<8x512xf32>
    %141 = arith.truncf %140 : vector<8x512xf32> to vector<8x512xbf16>
    %142 = arith.index_cast %c3_i32 : i32 to index
    %c0_66 = arith.constant 0 : index
    %c0_67 = arith.constant 0 : index
    %143 = vector.load %arg11[%142, %c0_66, %c0_67] : memref<4x512x64xbf16, #tpu.memory_space<vmem>>, vector<1x512x64xbf16>
    %144 = vector.shape_cast %143 : vector<1x512x64xbf16> to vector<512x64xbf16>
    %cst_68 = arith.constant dense<0.000000e+00> : vector<8x64xf32>
    %145 = tpu.matmul %141, %144, %cst_68 {dimension_numbers = #tpu.dot_dimension_numbers<[1], [0], [0], [1], [0, 0, 1, 1], [], []>} : vector<8x512xbf16>, vector<512x64xbf16>, vector<8x64xf32> -> vector<8x64xf32>
    %146 = arith.addf %129, %145 : vector<8x64xf32>
    %c4_i32 = arith.constant 4 : i32
    %147 = vector.broadcast %5 : vector<1x64xf32> to vector<8x64xf32>
    %148 = arith.addf %146, %147 : vector<8x64xf32>
    %149 = arith.addf %76, %148 : vector<8x64xf32>
    %cst_69 = arith.constant dense<0.000000e+00> : vector<8xf32>
    %150 = vector.multi_reduction <add>, %149, %cst_69 [1] : vector<8x64xf32> to vector<8xf32>
    %151 = vector.shape_cast %150 : vector<8xf32> to vector<8x1xf32>
    %cst_70 = arith.constant 6.400000e+01 : f32
    %152 = vector.broadcast %cst_70 : f32 to vector<8x1xf32>
    %153 = arith.divf %151, %152 : vector<8x1xf32>
    %154 = vector.broadcast %153 : vector<8x1xf32> to vector<8x64xf32>
    %155 = arith.subf %149, %154 : vector<8x64xf32>
    %156 = arith.mulf %155, %155 : vector<8x64xf32>
    %cst_71 = arith.constant dense<0.000000e+00> : vector<8xf32>
    %157 = vector.multi_reduction <add>, %156, %cst_71 [1] : vector<8x64xf32> to vector<8xf32>
    %158 = vector.shape_cast %157 : vector<8xf32> to vector<8x1xf32>
    %cst_72 = arith.constant 6.400000e+01 : f32
    %159 = vector.broadcast %cst_72 : f32 to vector<8x1xf32>
    %160 = arith.divf %158, %159 : vector<8x1xf32>
    %161 = vector.broadcast %153 : vector<8x1xf32> to vector<8x64xf32>
    %162 = arith.subf %149, %161 : vector<8x64xf32>
    %cst_73 = arith.constant 9.99999974E-6 : f32
    %163 = vector.broadcast %cst_73 : f32 to vector<8x1xf32>
    %164 = arith.addf %160, %163 : vector<8x1xf32>
    %165 = math.rsqrt %164 : vector<8x1xf32>
    %166 = vector.broadcast %165 : vector<8x1xf32> to vector<8x64xf32>
    %167 = arith.mulf %162, %166 : vector<8x64xf32>
    %168 = vector.broadcast %6 : vector<1x64xf32> to vector<8x64xf32>
    %169 = arith.mulf %167, %168 : vector<8x64xf32>
    %170 = vector.broadcast %7 : vector<1x64xf32> to vector<8x64xf32>
    %171 = arith.addf %169, %170 : vector<8x64xf32>
    %172 = arith.truncf %171 : vector<8x64xf32> to vector<8x64xbf16>
    %c0_74 = arith.constant 0 : index
    %c0_75 = arith.constant 0 : index
    %173 = vector.load %arg12[%c0_74, %c0_75] : memref<64x128xbf16, #tpu.memory_space<vmem>>, vector<64x128xbf16>
    %cst_76 = arith.constant dense<0.000000e+00> : vector<8x128xf32>
    %174 = tpu.matmul %172, %173, %cst_76 {dimension_numbers = #tpu.dot_dimension_numbers<[1], [0], [0], [1], [0, 0, 1, 1], [], []>} : vector<8x64xbf16>, vector<64x128xbf16>, vector<8x128xf32> -> vector<8x128xf32>
    %175 = vector.broadcast %8 : vector<1x128xf32> to vector<8x128xf32>
    %176 = arith.addf %174, %175 : vector<8x128xf32>
    %c0_77 = arith.constant 0 : index
    %c0_78 = arith.constant 0 : index
    %177 = vector.load %arg14[%c0_77, %c0_78] : memref<8x128xf32, #tpu.memory_space<vmem>>, vector<8x128xf32>
    tpu.vector_store %arg14[%c0_77, %c0_78], %176 {strides = array<i32>} : memref<8x128xf32, #tpu.memory_space<vmem>>, vector<8x128xf32>,
    return
  }
  func.func @transform_0(%arg0: i32) -> (i32, i32, i32) {
    %c0_i32 = arith.constant 0 : i32
    %c0_i32_0 = arith.constant 0 : i32
    %c0_i32_1 = arith.constant 0 : i32
    return %arg0, %c0_i32, %c0_i32_0 : i32, i32, i32
  }
  func.func @transform_1(%arg0: i32) -> (i32, i32) {
    %c0_i32 = arith.constant 0 : i32
    %c0_i32_0 = arith.constant 0 : i32
    return %arg0, %c0_i32 : i32, i32
  }
  func.func @transform_2(%arg0: i32) -> (i32, i32) {
    %c0_i32 = arith.constant 0 : i32
    %c0_i32_0 = arith.constant 0 : i32
    return %arg0, %c0_i32 : i32, i32
  }
  func.func @transform_3(%arg0: i32) -> (i32, i32, i32) {
    %c0_i32 = arith.constant 0 : i32
    %c0_i32_0 = arith.constant 0 : i32
    %c0_i32_1 = arith.constant 0 : i32
    return %arg0, %c0_i32, %c0_i32_0 : i32, i32, i32
  }
  func.func @transform_4(%arg0: i32) -> (i32, i32) {
    %c0_i32 = arith.constant 0 : i32
    %c0_i32_0 = arith.constant 0 : i32
    %c0_i32_1 = arith.constant 0 : i32
    return %c0_i32, %c0_i32_0 : i32, i32
  }
  func.func @transform_5(%arg0: i32) -> (i32, i32) {
    %c0_i32 = arith.constant 0 : i32
    %c0_i32_0 = arith.constant 0 : i32
    %c0_i32_1 = arith.constant 0 : i32
    return %c0_i32, %c0_i32_0 : i32, i32
  }
  func.func @transform_6(%arg0: i32) -> (i32, i32) {
    %c0_i32 = arith.constant 0 : i32
    %c0_i32_0 = arith.constant 0 : i32
    %c0_i32_1 = arith.constant 0 : i32
    return %c0_i32, %c0_i32_0 : i32, i32
  }
  func.func @transform_7(%arg0: i32) -> (i32, i32) {
    %c0_i32 = arith.constant 0 : i32
    %c0_i32_0 = arith.constant 0 : i32
    %c0_i32_1 = arith.constant 0 : i32
    return %c0_i32, %c0_i32_0 : i32, i32
  }
  func.func @transform_8(%arg0: i32) -> (i32, i32, i32) {
    %c0_i32 = arith.constant 0 : i32
    %c0_i32_0 = arith.constant 0 : i32
    %c0_i32_1 = arith.constant 0 : i32
    %c0_i32_2 = arith.constant 0 : i32
    return %c0_i32, %c0_i32_0, %c0_i32_1 : i32, i32, i32
  }
  func.func @transform_9(%arg0: i32) -> (i32, i32, i32) {
    %c0_i32 = arith.constant 0 : i32
    %c0_i32_0 = arith.constant 0 : i32
    %c0_i32_1 = arith.constant 0 : i32
    %c0_i32_2 = arith.constant 0 : i32
    return %c0_i32, %c0_i32_0, %c0_i32_1 : i32, i32, i32
  }
  func.func @transform_10(%arg0: i32) -> (i32, i32, i32) {
    %c0_i32 = arith.constant 0 : i32
    %c0_i32_0 = arith.constant 0 : i32
    %c0_i32_1 = arith.constant 0 : i32
    %c0_i32_2 = arith.constant 0 : i32
    return %c0_i32, %c0_i32_0, %c0_i32_1 : i32, i32, i32
  }
  func.func @transform_11(%arg0: i32) -> (i32, i32) {
    %c0_i32 = arith.constant 0 : i32
    %c0_i32_0 = arith.constant 0 : i32
    %c0_i32_1 = arith.constant 0 : i32
    return %c0_i32, %c0_i32_0 : i32, i32
  }
  func.func @transform_12(%arg0: i32) -> (i32, i32) {
    %c0_i32 = arith.constant 0 : i32
    %c0_i32_0 = arith.constant 0 : i32
    %c0_i32_1 = arith.constant 0 : i32
    return %c0_i32, %c0_i32_0 : i32, i32
  }
  func.func @transform_13(%arg0: i32) -> (i32, i32) {
    %c0_i32 = arith.constant 0 : i32
    %c0_i32_0 = arith.constant 0 : i32
    return %arg0, %c0_i32 : i32, i32
  }
}

</mosaic_0001>

<bundles_post_ra>
// kernel: tpu_custom_call.1
= control target key start
LH: loop header
LB: loop body
LE: loop exit
PB: predicated region body
PF: predicated region fallthrough
CT: control target
= control target key end

     0   :  { %s6061_s0 = inlined_call_operand.vmem [shape: f32[16,8,16], index: 0, kind: input, shape index: {}]   ;;  %s6062_s1 = inlined_call_operand.vmem [shape: f32[16,16], index: 1, kind: input, shape index: {}]   ;;  %s6063_s2 = inlined_call_operand.vmem [shape: f32[16,64], index: 2, kind: input, shape index: {}]   ;;  %s6064_s3 = inlined_call_operand.vmem [shape: f32[16,1,128], index: 3, kind: input, shape index: {}]   ;;  %s6065_s4 = inlined_call_operand.vmem [shape: bf16[16,64], index: 4, kind: input, shape index: {}]   ;;  %s6066_s5 = inlined_call_operand.vmem [shape: bf16[16,128], index: 5, kind: input, shape index: {}]   ;;  %s6067_s6 = inlined_call_operand.vmem [shape: bf16[64,128], index: 6, kind: input, shape index: {}]   ;;  %s6068_s7 = inlined_call_operand.vmem [shape: bf16[128,64], index: 7, kind: input, shape index: {}]   ;;  %s6069_s8 = inlined_call_operand.vmem [shape: bf16[4,64,512], index: 8, kind: input, shape index: {}]   ;;  %s6070_s9 = inlined_call_operand.vmem [shape: f32[4,1,512], index: 9, kind: input, shape index: {}]   ;;  %s6071_s10 = inlined_call_operand.vmem [shape: bf16[4,512,64], index: 10, kind: input, shape index: {}]   ;;  %s6072_s11 = inlined_call_operand.vmem [shape: bf16[64,128], index: 11, kind: input, shape index: {}]   ;;  %s6073_s12 = inlined_call_operand.vmem [shape: f32[8,128], index: 12, kind: input, shape index: {}]   ;;  %s6074_s13 = inlined_call_operand.hbm [shape: f32[16,128], index: 13, kind: output, shape index: {}]  }
   0x1   :  { %6076 = sst [smem:[#allocation7_spill]] %s6065_s4 }
   0x2   :  { %6077 = sst [smem:[#allocation8_spill]] %s6066_s5 }
   0x3   :  { %18 = vsyncpa [#allocation3], 0 }
   0x4   :  { %20 = vsyncpa [#allocation3 + $0x1], 0  ;;  %s5034_s25 = smov 0   ;;  %s5036_s26 = smov 0  }
   0x5   :  { %s5038_s27 = smov 0   ;;  %s5040_s28 = smov 0  }
   0x6 LB: > { %6078 = sst [smem:[#allocation5_spill]] %s4953_s27  ;;  %s5055_s29 = sadd.s32 4294967295, %s4957_s28   ;;  %s4957_s28 = sphi %s5040_s28, %s6088_s28   ;;  %s4953_s27 = sphi %s5038_s27, %s6085_s27   ;;  %s4949_s26 = sphi %s5036_s26, %s6087_s26   ;;  %s4945_s25 = sphi %s5034_s25, %s6086_s25  }
   0x7   : > { %s3835_s30 = sadd.s32 4294967294, %s4957_s28   ;;  %s5059_s14 = sadd.s32 1, %s4957_s28  }
   0x8   : > { %s326_s15 = sadd.s32 1, %s4953_s27  ;;  %s323_s16 = ssub.s32 %s4957_s28, %s5059_s14 }
   0x9   : > { %p336_p0 = scmp.ne.s32.totalorder %s4953_s27, %s4949_s26  ;;  %p324_p1 = scmp.eq.s32.totalorder %s323_s16, 0 }
   0xa   : > { %p337_p2 = scmp.eq.s32.totalorder %s5055_s29, 1  ;;  %p342_p3 = scmp.ne.s32.totalorder %s4949_s26, %s4945_s25 }
   0xb   : > { %p343_p4 = scmp.eq.s32.totalorder %s3835_s30, 1  ;;  %p3838_p7 = scmp.ge.s32.totalorder %s4957_s28, 1 }
   0xc   : > { %s5070_s17 = scalar_select %p324_p1, %s4953_s27, %s326_s15  }
   0xd   : > { %p5072_p5 = por %p337_p2, %p336_p0  ;;  %p5076_p6 = por %p343_p4, %p342_p3 }
   0xe   : > { %6079 = sst [smem:[#allocation6_spill]] %s5070_s17  ;;  %p419_p8 = scmp.lt.s32.totalorder %s4957_s28, 3 }
  0x10   : > { %p420_p9 = pnand %p3838_p7, %p419_p8 }
  0x11   : > { %s6082_s4 = sld [smem:[#allocation7_spill]] (!%p420_p9)  ;;  %p481_p10 = scmp.lt.s32.totalorder (!%p420_p9), %s5055_s29, 1 }
  0x12   : > { %423 = sbr.rel (%p420_p9) target bundleno = 3160 (0xc58), region = 72  ;;  %s6083_s5 = sld [smem:[#allocation8_spill]] (!%p420_p9) }
  0x13   : > { %s3840_s24 = sshll.u32 (!%p420_p9), %s5055_s29, 3  ;;  %s472_s16 = sand.u32 (!%p420_p9), 1, %s4949_s26  }
  0x14   : > { %p476_p11 = scmp.lt.s32.totalorder (!%p420_p9), %s3840_s24, 15 }
  0x17   : > { %v4632_v0 = vld [vmem:[%s6082_s4] sm:$0xff]   ;;  %v4959_v1 = vmov 0.0   ;;  %vm4960_vm0 = vmmov 0   ;;  %s5094_s30 = scalar_select %p481_p10, %s5055_s29, 1  ;;  %vm516_vm1 = vcmask 130048   ;;  %v4634_v5 = vld [vmem:[%s6067_s6 + $0x18] sm:$0xff]   ;;  %v721_v32 = vlaneseq }
  0x18   : > { %4537 = vmatprep.subr.bf16.mxu1 %v4959_v1  ;;  %v4633_v2 = vld [vmem:[%s6083_s5] sm:$0xff]   ;;  %4539 = vmatprep.mubr.msk.bf16.mxu1 %vm4960_vm0, %v4959_v1  ;;  %s6090_s24 = smov (!%p476_p11, %s3840_s24), 15  ;;  %v4635_v17 = vld [vmem:[%s6067_s6 + $0x10] sm:$0xff]   ;;  %v4636_v18 = vld [vmem:[%s6067_s6 + $0x8] sm:$0xff]   ;;  %vm749_vm2 = vcmask 523264   ;;  %vm957_vm3 = vcmask 1041409  }
  0x19   : > { %4538 = vmatpush3.bf16.msra.mxu1 %v4632_v0  ;;  %4527 = vmatprep.subr.bf16.mxu0 %v4633_v2  ;;  %s3842_s15 = sshll.u32 %s5094_s30, 3  ;;  %s3841_s22 = sshll.u32 %s6090_s24, 3  ;;  %v4637_v20 = vld [vmem:[%s6067_s6] sm:$0xff]   ;;  %v5145_v34 = vshrl.u32 %v721_v32, 7  ;;  %v4961_v36 = vmov 1966171168  }
  0x1a   : > { %4555 = vmatprep.subr.bf16.mxu1 %v4959_v1  ;;  %4528 = vmatpush3.bf16.msra.mxu0 %v4633_v2  ;;  %s484_s21 = scalar_lea.vmem %s6062_s1, %s3842_s15  ;;  %s479_s5 = scalar_lea.vmem %s6061_s0, %s3841_s22  ;;  %v796_v37 = vunpack.c.l.s4 %v4961_v36  ;;  %v5153_v40 = vld [vmem:[%s6073_s12] sm:$0xff]  ;;  %v924_v36 = vand.u32 127, %v721_v32  ;;  %vm959_vm4 = vcmask 1042434   ;;  %vm961_vm5 = vcmask 1043459  }
  0x1b   : > { %4543 = vmatprep.subr.bf16.mxu0 %v4959_v1  ;;  %v658_v3 = vld [vmem:[%s484_s21] sm:$0xff]  ;;  %v497_v7 = vld [vmem:[%s479_s5 + $0x8] sm:$0xff]  ;;  %v498_v8 = vld [vmem:[%s479_s5 + $0x10] sm:$0xff]  ;;  %s488_s23 = scalar_lea.vmem %s6063_s2, %s3842_s15  ;;  %v5148_v38 = vsub.s32 0, %v5145_v34  ;;  %s5162_s27 = scalar_lea.vmem %s6064_s3, %s6090_s24  ;;  %vm963_vm6 = vcmask 1044484   ;;  %vm965_vm7 = vcmask 1045509  }
  0x1c   : > { %v659_v4 = vpack.c.bf16 %v658_v3, %v658_v3  ;;  %v496_v6 = vld [vmem:[%s479_s5] sm:$0xff]  ;;  %v499_v10 = vld [vmem:[%s479_s5 + $0x18] sm:$0xff]  ;;  %v501_v12 = vld [vmem:[%s479_s5 + $0x28] sm:$0xff]  ;;  %v797_v41 = vunpack.c.0.s8 %v796_v37  ;;  %vm967_vm8 = vcmask 1046534   ;;  %vm969_vm9 = vcmask 1047559   ;;  %s4322_s24 = sshll.u32 %s5055_s29, 7 }
  0x1d   : > { %v504_v9 = vpack.c.bf16 %v497_v7, %v496_v6  ;;  %v500_v11 = vld [vmem:[%s479_s5 + $0x20] sm:$0xff]  ;;  %v505_v13 = vpack.c.bf16 %v499_v10, %v498_v8  ;;  %v502_v15 = vld [vmem:[%s479_s5 + $0x30] sm:$0xff]  ;;  %v503_v16 = vld [vmem:[%s479_s5 + $0x38] sm:$0xff]  ;;  %v724_v42 = vrot.slane %v5153_v40, %v5148_v38  ;;  %vm972_vm10 = vcmask 64512   ;;  %s6020_s22 = scalar_lea.hbm %s6074_s13, %s4322_s24  ;;  %s4963_s29 = smov [#allocation2]  }
  0x1e   : > { %4540 = vmatmul.mubr.msk.bf16.vlgmr.msra.gmra.mxu1 %vm516_vm1, %v659_v4  ;;  %v506_v14 = vpack.c.bf16 %v501_v12, %v500_v11  ;;  %v507_v19 = vpack.c.bf16 %v503_v16, %v502_v15  ;;  %v662_v21 = vld [vmem:[%s488_s23] sm:$0xff]  ;;  %v800_v44 = vsub.s32 %v797_v41, %v5145_v34  ;;  %s3730_s23 = scalar_lea.sflag [#allocation3], %s472_s16  ;;  %s4901_s15 = sshll.u32 %s4963_s29, 4  ;;  %s4902_s15 = int_to_ptr.vmem [resolvable:$false] %s4901_s15 }
  0x1f   : > { %4571 = vmatprep.mubr.msk.bf16.mxu1 %vm4960_vm0, %v4959_v1  ;;  %4529 = vmatprep.mubr.msk.bf16.mxu0 %vm516_vm1, %v504_v9  ;;  %v3850_v48 = vld [vmem:[%s5162_s27] ss:$0 sm:$0xff]  ;;  %v3852_v52 = vld [vmem:[%s5162_s27 + $0x2] ss:$0 sm:$0xff]  ;;  %v3851_v63 = vld [vmem:[%s5162_s27 + $0x1] ss:$0 sm:$0xff] }
  0x20   : > { %4530 = vmatmul.mubr.msk.bf16.vlgmr.msra.gmra.mxu0 %vm516_vm1, %v505_v13  ;;  %v3853_v6 = vld [vmem:[%s5162_s27 + $0x3] ss:$0 sm:$0xff]  ;;  %v3854_v11 = vld [vmem:[%s5162_s27 + $0x4] ss:$0 sm:$0xff]  ;;  %v3855_v16 = vld [vmem:[%s5162_s27 + $0x5] ss:$0 sm:$0xff] }
  0x21   : > { %4544 = vmatpush3.bf16.msra.mxu0 %v4634_v5  ;;  %4533 = vmatprep.mubr.msk.bf16.mxu0 %vm516_vm1, %v506_v14  ;;  %s4903_s4 = scalar_lea.vmem %s4902_s15, 256 }
  0x22   : > { %4545 = vmatprep.subr.bf16.mxu0 %v4959_v1 }
  0x25   : > { %4546 = vmatpush3.bf16.msra.mxu0 %v4635_v17 }
  0x26   : > { %4547 = vmatprep.subr.bf16.mxu0 %v4959_v1 }
  0x28   : > { %4534 = vmatmul.mubr.msk.bf16.gmra.mxu0 %vm516_vm1, %v507_v19 }
  0x29   : > { %4548 = vmatpush3.bf16.msra.mxu0 %v4636_v18  ;;  %4551 = vmatprep.mubr.msk.bf16.mxu0 %vm4960_vm0, %v4959_v1 }
  0x2a   : > { %4549 = vmatprep.subr.bf16.mxu0 %v4959_v1 }
  0x2d   : > { %4550 = vmatpush3.bf16.msra.mxu0 %v4637_v20 }
  0xde   : > { %v706_v22 = vpop.f32.mrf.mxu1 }
  0xdf   : > { %v5139_v23 = vadd.f32 %v706_v22, %v662_v21  ;;  %v3856_v21 = vld [vmem:[%s5162_s27 + $0x6] ss:$0 sm:$0xff] }
  0xe0   : > { %v4541_v24 = vpop.f32.mrf.mxu1  ;;  %v4531_v28 = vpop.f32.mrf.mxu0 }
  0xe1   : > { %v712_v25 = vpack.c.bf16 %v5139_v23, %v5139_v23  ;;  %v5169_v62 = vadd.f32 %v4531_v28, %v3852_v52 }
  0xe2   : > { %v709_v26 = vpop.f32.mrf.mxu1  ;;  %v563_v29 = vpop.f32.mrf.mxu0 }
  0xe3   : > { %4552 = vmatmul.mubr.msk.bf16.vlgmr.msra.gmra.mxu0 %vm749_vm2, %v712_v25  ;;  %v5166_v56 = vadd.f32 %v3850_v48, %v563_v29  ;;  %v3857_v26 = vld [vmem:[%s5162_s27 + $0x7] ss:$0 sm:$0xff]  ;;  %s3839_s27 = sshll.u32 %s472_s16, 3 }
  0xe4   : > { %v4542_v27 = vpop.f32.mrf.mxu1  ;;  %v4532_v30 = vpop.f32.mrf.mxu0  ;;  %s474_s17 = scalar_lea.vmem [#allocation2], %s3839_s27 }
  0xe5   : > { %v5181_v12 = vadd.f32 %v4532_v30, %v3853_v6  ;;  %s3743_s5 = sshll.u32 %s474_s17, 4  ;;  %s6022_s5 = int_to_ptr.vmem [resolvable:$true] %s3743_s5 }
  0xe6   : > { %v566_v31 = vpop.f32.mrf.mxu0  ;;  %s4897_s30 = scalar_lea.vmem %s6022_s5, 128  ;;  %p4904_p1 = scmp.lt.s32.totalorder %s6022_s5, %s4902_s15 }
  0xe7   : > { %v5176_v7 = vadd.f32 %v3851_v63, %v566_v31  ;;  %p4898_p12 = scmp.ne.s32.totalorder %s6022_s5, %s4897_s30  ;;  %p4905_p2 = scmp.lt.s32.totalorder %s4903_s4, %s4897_s30 }
  0xe8   : > { %v4535_v33 = vpop.f32.mrf.mxu0 }
  0xe9   : > { %v5196_v27 = vadd.f32 %v4535_v33, %v3856_v21  ;;  %v5206_v33 = vsub.s32 %v924_v36, %v5145_v34  ;;  %p4899_p13 = pnand %p4898_p12, %p5072_p5  ;;  %p4906_p3 = por %p4905_p2, %p4904_p1 }
  0xea   : > { %v579_v35 = vpop.f32.mrf.mxu0 }
  0xeb   : > { %v5186_v17 = vadd.f32 %v3854_v11, %v579_v35  ;;  %v5228_v11 = vsub.s32 1, %v5145_v34  ;;  %p4900_p0 = pneg %p4899_p13 }
  0xec   : > { %v4536_v39 = vpop.f32.mrf.mxu0 }
  0xed   : > { %v5200_v30 = vadd.f32 %v4536_v39, %v3857_v26  ;;  %p4907_p4 = pnand %p4906_p3, %p4900_p0 }
  0xee   : > { %v582_v43 = vpop.f32.mrf.mxu0 }
  0xef   : > { %v5191_v22 = vadd.f32 %v3855_v16, %v582_v43 }
 0x1a3   : > { %v787_v45 = vpop.f32.mrf.mxu0 }
 0x1a4   : > { %v788_v46 = vadd.f32 %v787_v45, %v724_v42 }
 0x1a5   : > { %v4553_v47 = vpop.f32.mrf.mxu0 }
 0x1a6   : > { %v794_v49 = vcombine.high %v788_v46, %v788_v46  ;;  %v801_v50 = vrot.slane %v788_v46, %v800_v44 }
 0x1a7   : > { %v790_v51 = vpop.f32.mrf.mxu0 }
 0x1a8   : > { %v808_v53 = vrot.slane %v794_v49, %v800_v44  ;;  %v809_v54 = vcombine.high %v801_v50, %v801_v50  ;;  %v817_v55 = vrot.slane %v801_v50, %v800_v44 }
 0x1a9   : > { %v4554_v57 = vpop.f32.mrf.mxu0 }
 0x1aa   : > { %v810_v58 = vcombine.high %v808_v53, %v808_v53  ;;  %v846_v59 = vrot.slane %v817_v55, %v5148_v38  ;;  %v839_v60 = vcombine.high %v817_v55, %v817_v55  ;;  %v831_v61 = vrot.slane %v809_v54, %v800_v44 }
 0x1ab   : > { %v824_v0 = vrot.slane %v808_v53, %v800_v44 }
 0x1ac   : > { %v883_v2 = vmul.f32 %v846_v59, %v5166_v56  ;;  %v854_v3 = vrot.slane %v839_v60, %v5148_v38  ;;  %v850_v4 = vrot.slane %v831_v61, %v5148_v38  ;;  %v841_v5 = vcombine.high %v831_v61, %v831_v61 }
 0x1ad   : > { %v838_v10 = vrot.slane %v810_v58, %v800_v44  ;;  %v862_v14 = vrot.slane %v824_v0, %v5148_v38  ;;  %v840_v15 = vcombine.high %v824_v0, %v824_v0 }
 0x1ae   : > { %891 = vadd.xlane.f32.xlu0 %v883_v2  ;;  %v885_v8 = vmul.f32 %v854_v3, %v5169_v62  ;;  %v858_v9 = vrot.slane %v841_v5, %v5148_v38  ;;  %v884_v13 = vmul.f32 %v850_v4, %v5176_v7 }
 0x1af   : > { %v866_v19 = vrot.slane %v838_v10, %v5148_v38  ;;  %v842_v20 = vcombine.high %v838_v10, %v838_v10  ;;  %v887_v24 = vmul.f32 %v862_v14, %v5186_v17  ;;  %v870_v25 = vrot.slane %v840_v15, %v5148_v38 }
 0x1b0   : > { %895 = vadd.xlane.f32.xlu1 %v885_v8  ;;  %v886_v18 = vmul.f32 %v858_v9, %v5181_v12  ;;  %v4962_v10 = vmov 0   ;;  %v5234_v14 = vsub.s32 3, %v5145_v34 }
 0x1b1   : > { %v888_v28 = vmul.f32 %v866_v19, %v5191_v22  ;;  %v874_v29 = vrot.slane %v842_v20, %v5148_v38  ;;  %v889_v31 = vmul.f32 %v870_v25, %v5196_v27  ;;  %4631 = vset.pattern.permute.xlu0 %v4962_v10  ;;  %4630 = vset.pattern.permute.xlu1 %v4962_v10  ;;  %v5240_v20 = vsub.s32 4, %v5145_v34 }
 0x1b2   : > { %893 = vadd.xlane.f32.xlu0 %v884_v13  ;;  %1582 = vmatprep.mubr.bf16.mxu0 %v4962_v10  ;;  %v5231_v13 = vsub.s32 2, %v5145_v34 }
 0x1b3   : > { %v890_v35 = vmul.f32 %v874_v29, %v5200_v30 }
 0x1b4   : > { %897 = vadd.xlane.f32.xlu1 %v886_v18 }
 0x1b6   : > { %899 = vadd.xlane.f32.xlu0 %v887_v24 }
 0x1b8   : > { %901 = vadd.xlane.f32.xlu1 %v888_v28 }
 0x1ba   : > { %903 = vadd.xlane.f32.xlu0 %v889_v31  ;;  %v5244_v31 = vsub.s32 5, %v5145_v34 }
 0x1bc   : > { %905 = vadd.xlane.f32.xlu1 %v890_v35 }
 0x237   : > { %v892_v37 = vpop.xlane.xlu0 %891 }
 0x238   : > { %v907_v42 = vmul.f32 0.125, %v892_v37 }
 0x239   : > { %v896_v41 = vpop.xlane.xlu1 %895 }
 0x23a   : > { %v909_v43 = vmul.f32 0.125, %v896_v41  ;;  %v928_v46 = vrot.slane %v907_v42, %v5206_v33  ;;  %v5248_v41 = vsub.s32 6, %v5145_v34 }
 0x23b   : > { %v894_v44 = vpop.xlane.xlu0 %893 }
 0x23c   : > { %v908_v45 = vmul.f32 0.125, %v894_v44  ;;  %v936_v49 = vrot.slane %v909_v43, %v5206_v33 }
 0x23d   : > { %v898_v39 = vpop.xlane.xlu1 %897 }
 0x23e   : > { %v932_v47 = vrot.slane %v908_v45, %v5206_v33  ;;  %v910_v48 = vmul.f32 0.125, %v898_v39 }
 0x23f   : > { %v900_v32 = vpop.xlane.xlu0 %899 }
 0x240   : > { %v958_v50 = vsel %vm957_vm3, %v932_v47, %v928_v46  ;;  %v940_v51 = vrot.slane %v910_v48, %v5206_v33  ;;  %v911_v52 = vmul.f32 0.125, %v900_v32 }
 0x241   : > { %v960_v53 = vsel %vm959_vm4, %v936_v49, %v958_v50  ;;  %v902_v54 = vpop.xlane.xlu1 %901 }
 0x242   : > { %v962_v55 = vsel %vm961_vm5, %v940_v51, %v960_v53  ;;  %v944_v57 = vrot.slane %v911_v52, %v5206_v33  ;;  %v912_v58 = vmul.f32 0.125, %v902_v54 }
 0x243   : > { %v904_v59 = vpop.xlane.xlu0 %903 }
 0x244   : > { %v964_v60 = vsel %vm963_vm6, %v944_v57, %v962_v55  ;;  %v948_v61 = vrot.slane %v912_v58, %v5206_v33  ;;  %v913_v63 = vmul.f32 0.125, %v904_v59 }
 0x245   : > { %v906_v0 = vpop.xlane.xlu1 %905 }
 0x246   : > { %v952_v2 = vrot.slane %v913_v63, %v5206_v33  ;;  %v914_v3 = vmul.f32 0.125, %v906_v0  ;;  %v966_v4 = vsel %vm965_vm7, %v948_v61, %v964_v60 }
 0x248   : > { %v956_v5 = vrot.slane %v914_v3, %v5206_v33  ;;  %v968_v6 = vsel %vm967_vm8, %v952_v2, %v966_v4 }
 0x24a   : > { %v970_v8 = vsel %vm969_vm9, %v956_v5, %v968_v6 }
 0x24b   : > { %v973_v9 = vsel %vm972_vm10, %v970_v8, -inf }
 0x24c   : > { %974 = vmax.xlane.f32.xlu0 %v973_v9 }
 0x2d5   : > { %v975_v15 = vpop.xlane.xlu0 %974 }
 0x2d6   : > { %v980_v16 = vrot.slane %v975_v15, %v5148_v38  ;;  %v984_v18 = vrot.slane %v975_v15, %v5228_v11  ;;  %v988_v19 = vrot.slane %v975_v15, %v5231_v13  ;;  %v992_v21 = vrot.slane %v975_v15, %v5234_v14 }
 0x2d7   : > { %v996_v35 = vrot.slane %v975_v15, %v5240_v20  ;;  %v1000_v44 = vrot.slane %v975_v15, %v5244_v31 }
 0x2d8   : > { %v1017_v24 = vsub.f32 %v907_v42, %v980_v16  ;;  %v1018_v25 = vsub.f32 %v908_v45, %v984_v18  ;;  %v1019_v26 = vsub.f32 %v909_v43, %v988_v19  ;;  %v1020_v36 = vsub.f32 %v910_v48, %v992_v21 }
 0x2d9   : > { %v1021_v39 = vsub.f32 %v911_v52, %v996_v35  ;;  %v5252_v43 = vsub.s32 7, %v5145_v34  ;;  %v1004_v45 = vrot.slane %v975_v15, %v5248_v41  ;;  %v1022_v46 = vsub.f32 %v912_v58, %v1000_v44 }
 0x2da   : > { %v1025_v28 = vmul.f32 1.442695, %v1017_v24  ;;  %v1027_v29 = vmul.f32 1.442695, %v1018_v25  ;;  %v1029_v37 = vmul.f32 1.442695, %v1019_v26 }
 0x2db   : > { %v1031_v42 = vmul.f32 1.442695, %v1020_v36  ;;  %v1033_v47 = vmul.f32 1.442695, %v1021_v39  ;;  %v1008_v48 = vrot.slane %v975_v15, %v5252_v43  ;;  %v1023_v49 = vsub.f32 %v913_v63, %v1004_v45 }
 0x2dc   : > { %4874 = vpow2.f32 %v1025_v28  ;;  %v1035_v32 = vmul.f32 1.442695, %v1022_v46 }
 0x2dd   : > { %4876 = vpow2.f32 %v1027_v29  ;;  %v1024_v52 = vsub.f32 %v914_v3, %v1008_v48  ;;  %v1037_v53 = vmul.f32 1.442695, %v1023_v49 }
 0x2de   : > { %4878 = vpow2.f32 %v1029_v37 }
 0x2df   : > { %4880 = vpow2.f32 %v1031_v42  ;;  %v1039_v34 = vmul.f32 1.442695, %v1024_v52 }
 0x2e0   : > { %4882 = vpow2.f32 %v1033_v47 }
 0x2e1   : > { %4884 = vpow2.f32 %v1035_v32 }
 0x2e2   : > { %4886 = vpow2.f32 %v1037_v53 }
 0x2e3   : > { %4888 = vpow2.f32 %v1039_v34 }
 0x2e9   : > { %v4875_v50 = vpop.eup %4874 }
 0x2ea   : > { %v4877_v51 = vpop.eup %4876  ;;  %1050 = vperm.xlu1 %4630, %v4875_v50  }
 0x2eb   : > { %1053 = vperm.xlu0 %4631, %v4877_v51   ;;  %v4879_v54 = vpop.eup %4878 }
 0x2ec   : > { %v4881_v55 = vpop.eup %4880 }
 0x2ed   : > { %v4883_v57 = vpop.eup %4882 }
 0x2ee   : > { %1056 = vperm.xlu1 %4630, %v4879_v54   ;;  %v4885_v58 = vpop.eup %4884 }
 0x2ef   : > { %v4887_v59 = vpop.eup %4886 }
 0x2f0   : > { %v4889_v60 = vpop.eup %4888 }
 0x2f2   : > { %1059 = vperm.xlu1 %4630, %v4881_v55  }
 0x2f6   : > { %1062 = vperm.xlu1 %4630, %v4883_v57  }
 0x2fa   : > { %1065 = vperm.xlu1 %4630, %v4885_v58  }
 0x2fe   : > { %1068 = vperm.xlu1 %4630, %v4887_v59  }
 0x302   : > { %1071 = vperm.xlu1 %4630, %v4889_v60  }
 0x365   : > { %v1051_v61 = vpop.permute.xlu1 %1050 }
 0x366   : > { %v1054_v3 = vpop.permute.xlu0 %1053  ;;  %v1076_v6 = vrot.slane %v1051_v61, %v5206_v33 }
 0x367   : > { %v1080_v5 = vrot.slane %v1054_v3, %v5206_v33  ;;  %v4644_v3 = vld [vmem:[%s6068_s7 + $0x8] sm:$0xff]  }
 0x369   : > { %v1057_v63 = vpop.permute.xlu1 %1056  ;;  %v1105_v18 = vsel %vm957_vm3, %v1080_v5, %v1076_v6 }
 0x36a   : > { %v1084_v8 = vrot.slane %v1057_v63, %v5206_v33 }
 0x36c   : > { %v1106_v21 = vsel %vm959_vm4, %v1084_v8, %v1105_v18 }
 0x36d   : > { %v1060_v0 = vpop.permute.xlu1 %1059 }
 0x36e   : > { %v1088_v9 = vrot.slane %v1060_v0, %v5206_v33 }
 0x370   : > { %v1107_v25 = vsel %vm961_vm5, %v1088_v9, %v1106_v21 }
 0x371   : > { %v1063_v2 = vpop.permute.xlu1 %1062 }
 0x372   : > { %v1092_v15 = vrot.slane %v1063_v2, %v5206_v33  ;;  %v4643_v2 = vld [vmem:[%s6068_s7 + $0x10] sm:$0xff]  }
 0x374   : > { %v1108_v26 = vsel %vm963_vm6, %v1092_v15, %v1107_v25 }
 0x375   : > { %v1066_v4 = vpop.permute.xlu1 %1065 }
 0x376   : > { %v1096_v19 = vrot.slane %v1066_v4, %v5206_v33  ;;  %v4645_v4 = vld [vmem:[%s6068_s7] sm:$0xff]  }
 0x378   : > { %v1109_v29 = vsel %vm965_vm7, %v1096_v19, %v1108_v26 }
 0x379   : > { %v1069_v16 = vpop.permute.xlu1 %1068 }
 0x37a   : > { %v1100_v24 = vrot.slane %v1069_v16, %v5206_v33 }
 0x37c   : > { %v1110_v36 = vsel %vm967_vm8, %v1100_v24, %v1109_v29 }
 0x37d   : > { %v1072_v28 = vpop.permute.xlu1 %1071 }
 0x37e   : > { %v1104_v35 = vrot.slane %v1072_v28, %v5206_v33 }
 0x380   : > { %v1111_v37 = vsel %vm969_vm9, %v1104_v35, %v1110_v36 }
 0x381   : > { %v1113_v44 = vsel %vm972_vm10, %v1111_v37, 0.0 }
 0x382   : > { %1114 = vadd.xlane.f32.xlu1 %v1113_v44 }
 0x40b   : > { %v1115_v39 = vpop.xlane.xlu1 %1114 }
 0x40c   : > { %4890 = vrcp.f32 %v1115_v39 }
 0x419   : > { %v4891_v42 = vpop.eup %4890 }
 0x41a   : > { %v1121_v45 = vrot.slane %v4891_v42, %v5148_v38  ;;  %v1125_v47 = vrot.slane %v4891_v42, %v5228_v11  ;;  %v1129_v49 = vrot.slane %v4891_v42, %v5231_v13  ;;  %v1133_v32 = vrot.slane %v4891_v42, %v5234_v14 }
 0x41b   : > { %v1137_v53 = vrot.slane %v4891_v42, %v5240_v20  ;;  %v1141_v61 = vrot.slane %v4891_v42, %v5244_v31  ;;  %v1145_v63 = vrot.slane %v4891_v42, %v5248_v41  ;;  %v1149_v0 = vrot.slane %v4891_v42, %v5252_v43 }
 0x41c   : > { %v1158_v46 = vmul.f32 %v4875_v50, %v1121_v45  ;;  %v1159_v48 = vmul.f32 %v4877_v51, %v1125_v47  ;;  %v1160_v33 = vmul.f32 %v4879_v54, %v1129_v49  ;;  %v1161_v52 = vmul.f32 %v4881_v55, %v1133_v32  ;;  %v4638_v51 = vld [vmem:[%s6068_s7 + $0x38] sm:$0xff]   ;;  %v4639_v55 = vld [vmem:[%s6068_s7 + $0x30] sm:$0xff]  }
 0x41d   : > { %v1162_v34 = vmul.f32 %v4883_v57, %v1137_v53  ;;  %v1163_v50 = vmul.f32 %v4885_v58, %v1141_v61  ;;  %4556 = vmatpush3.bf16.msra.mxu1 %v4638_v51  ;;  %v1164_v54 = vmul.f32 %v4887_v59, %v1145_v63  ;;  %v1165_v57 = vmul.f32 %v4889_v60, %v1149_v0  ;;  %v4640_v58 = vld [vmem:[%s6068_s7 + $0x28] sm:$0xff]   ;;  %v4641_v59 = vld [vmem:[%s6068_s7 + $0x20] sm:$0xff]   ;;  %v4642_v60 = vld [vmem:[%s6068_s7 + $0x18] sm:$0xff]  }
 0x41e   : > { %1168 = vperm.xlu0 %4631, %v1158_v46   ;;  %4557 = vmatprep.subr.bf16.mxu1 %v4959_v1 }
 0x421   : > { %4558 = vmatpush3.bf16.msra.mxu1 %v4639_v55 }
 0x422   : > { %1173 = vperm.xlu0 %4631, %v1159_v48   ;;  %4559 = vmatprep.subr.bf16.mxu1 %v4959_v1 }
 0x425   : > { %4560 = vmatpush3.bf16.msra.mxu1 %v4640_v58 }
 0x426   : > { %1178 = vperm.xlu0 %4631, %v1160_v33   ;;  %4561 = vmatprep.subr.bf16.mxu1 %v4959_v1 }
 0x429   : > { %4562 = vmatpush3.bf16.msra.mxu1 %v4641_v59 }
 0x42a   : > { %1183 = vperm.xlu0 %4631, %v1161_v52   ;;  %4563 = vmatprep.subr.bf16.mxu1 %v4959_v1 }
 0x42d   : > { %4564 = vmatpush3.bf16.msra.mxu1 %v4642_v60 }
 0x42e   : > { %1188 = vperm.xlu0 %4631, %v1162_v34   ;;  %4565 = vmatprep.subr.bf16.mxu1 %v4959_v1 }
 0x431   : > { %4566 = vmatpush3.bf16.msra.mxu1 %v4643_v2 }
 0x432   : > { %1193 = vperm.xlu0 %4631, %v1163_v50   ;;  %4567 = vmatprep.subr.bf16.mxu1 %v4959_v1 }
 0x435   : > { %4568 = vmatpush3.bf16.msra.mxu1 %v4644_v3 }
 0x436   : > { %1198 = vperm.xlu0 %4631, %v1164_v54   ;;  %4569 = vmatprep.subr.bf16.mxu1 %v4959_v1 }
 0x439   : > { %4570 = vmatpush3.bf16.msra.mxu1 %v4645_v4 }
 0x43a   : > { %1203 = vperm.xlu0 %4631, %v1165_v57  }
 0x499   : > { %v1169_v5 = vpop.permute.xlu0 %1168 }
 0x49a   : > { %v1206_v9 = vmul.f32 %v1169_v5, %v5166_v56 }
 0x49c   : > { %v1214_v19 = vrot.slane %v1206_v9, 4 }
 0x49d   : > { %v1174_v6 = vpop.permute.xlu0 %1173 }
 0x49e   : > { %v1207_v8 = vmul.f32 %v1174_v6, %v5176_v7  ;;  %v1215_v28 = vadd.f32 %v1214_v19, %v1206_v9 }
 0x4a0   : > { %v1220_v16 = vrot.slane %v1207_v8, 4  ;;  %v1216_v39 = vrot.slane %v1215_v28, 2 }
 0x4a1   : > { %v1179_v15 = vpop.permute.xlu0 %1178 }
 0x4a2   : > { %v1208_v18 = vmul.f32 %v1179_v15, %v5169_v62  ;;  %v1221_v25 = vadd.f32 %v1220_v16, %v1207_v8  ;;  %v1217_v48 = vadd.f32 %v1216_v39, %v1215_v28 }
 0x4a4   : > { %v1226_v21 = vrot.slane %v1208_v18, 4  ;;  %v1222_v37 = vrot.slane %v1221_v25, 2  ;;  %v1218_v63 = vrot.slane %v1217_v48, 1 }
 0x4a5   : > { %v1184_v24 = vpop.permute.xlu0 %1183 }
 0x4a6   : > { %v1209_v26 = vmul.f32 %v1184_v24, %v5181_v12  ;;  %v1227_v29 = vadd.f32 %v1226_v21, %v1208_v18  ;;  %v1223_v62 = vadd.f32 %v1222_v37, %v1221_v25  ;;  %v1219_v3 = vadd.f32 %v1218_v63, %v1217_v48 }
 0x4a7   : > { %v1289_v63 = vrot.slane %v5153_v40, %v5228_v11 }
 0x4a8   : > { %v1232_v35 = vrot.slane %v1209_v26, 4  ;;  %v1228_v7 = vrot.slane %v1227_v29, 2  ;;  %v1224_v34 = vrot.slane %v1223_v62, 1  ;;  %v1262_v24 = vpack.c.bf16 %v1219_v3, %v1219_v3 }
 0x4a9   : > { %v1189_v36 = vpop.permute.xlu0 %1188 }
 0x4aa   : > { %v1233_v44 = vadd.f32 %v1232_v35, %v1209_v26  ;;  %v1210_v56 = vmul.f32 %v1189_v36, %v5186_v17  ;;  %v1229_v49 = vadd.f32 %v1228_v7, %v1227_v29  ;;  %v1298_v39 = vunpack.c.l.b16 %v1262_v24  ;;  %v4666_v24 = vld [vmem:[%s6069_s8 + $0x4] ss:$16 sps:$4 sm:$0xff]  }
 0x4ac   : > { %v1234_v42 = vrot.slane %v1233_v44, 2  ;;  %v1238_v45 = vrot.slane %v1210_v56, 4  ;;  %v1230_v51 = vrot.slane %v1229_v49, 1 }
 0x4ad   : > { %v1194_v46 = vpop.permute.xlu0 %1193 }
 0x4ae   : > { %v1211_v47 = vmul.f32 %v1194_v46, %v5191_v22  ;;  %v1239_v33 = vadd.f32 %v1238_v45, %v1210_v56  ;;  %v1235_v12 = vadd.f32 %v1234_v42, %v1233_v44  ;;  %v1225_v22 = vadd.f32 %v1224_v34, %v1223_v62 }
 0x4af   : > { %v1231_v4 = vadd.f32 %v1230_v51, %v1229_v49 }
 0x4b0   : > { %v1244_v32 = vrot.slane %v1211_v47, 4  ;;  %v1240_v52 = vrot.slane %v1239_v33, 2  ;;  %v1236_v54 = vrot.slane %v1235_v12, 1  ;;  %v1263_v15 = vpack.c.bf16 %v1225_v22, %v1225_v22 }
 0x4b1   : > { %v1199_v53 = vpop.permute.xlu0 %1198  ;;  %v1264_v21 = vpack.c.bf16 %v1231_v4, %v1231_v4  ;;  %v4648_v4 = vld [vmem:[%s6069_s8 + $0x64] ss:$16 sps:$4 sm:$0xff]  }
 0x4b2   : > { %v1245_v61 = vadd.f32 %v1244_v32, %v1211_v47  ;;  %v1212_v50 = vmul.f32 %v1199_v53, %v5196_v27  ;;  %v1241_v17 = vadd.f32 %v1240_v52, %v1239_v33  ;;  %v1237_v5 = vadd.f32 %v1236_v54, %v1235_v12  ;;  %1558 = vmatprep.subr.bf16.mxu0 %v4648_v4  ;;  %v4706_v4 = vld [vmem:[%s6071_s10 + $0x148] sm:$0xff]  }
 0x4b3   : > { %v1299_v35 = vunpack.c.l.b16 %v1263_v15  ;;  %v1300_v44 = vunpack.c.l.b16 %v1264_v21  ;;  %v4655_v15 = vld [vmem:[%s6069_s8 + $0xc0] ss:$16 sps:$4 sm:$0xff]  }
 0x4b4   : > { %v1246_v0 = vrot.slane %v1245_v61, 2  ;;  %v1250_v55 = vrot.slane %v1212_v50, 4  ;;  %v1242_v57 = vrot.slane %v1241_v17, 1  ;;  %v1265_v25 = vpack.c.bf16 %v1237_v5, %v1237_v5  ;;  %v4651_v5 = vld [vmem:[%s6069_s8 + $0xe4] ss:$16 sps:$4 sm:$0xff]  }
 0x4b5   : > { %v1204_v58 = vpop.permute.xlu0 %1203  ;;  %v1306_v46 = vsel %vm957_vm3, %v1299_v35, %v1298_v39  ;;  %1832 = vmatprep.subr.bf16.mxu1 %v4651_v5  ;;  %v4661_v21 = vld [vmem:[%s6069_s8 + $0xa0] ss:$16 sps:$4 sm:$0xff]   ;;  %v4694_v35 = vld [vmem:[%s6071_s10 + $0x178] sm:$0xff]  }
 0x4b6   : > { %v1247_v59 = vadd.f32 %v1246_v0, %v1245_v61  ;;  %v1251_v60 = vadd.f32 %v1250_v55, %v1212_v50  ;;  %v1213_v2 = vmul.f32 %v1204_v58, %v5200_v30  ;;  %v1243_v27 = vadd.f32 %v1242_v57, %v1241_v17  ;;  %v4708_v5 = vld [vmem:[%s6071_s10 + $0x140] sm:$0xff]  }
 0x4b7   : > { %v1301_v7 = vunpack.c.l.b16 %v1265_v25  ;;  %v1307_v48 = vsel %vm959_vm4, %v1300_v44, %v1306_v46  ;;  %v4664_v25 = vld [vmem:[%s6069_s8] ss:$16 sps:$4 sm:$0xff]   ;;  %v1421_v44 = vrot.slane %v5153_v40, %v5231_v13  ;;  %v4670_v46 = vld [vmem:[%s6069_s8 + $0x68] ss:$16 sps:$4 sm:$0xff]  }
 0x4b8   : > { %v1248_v6 = vrot.slane %v1247_v59, 1  ;;  %v1252_v8 = vrot.slane %v1251_v60, 2  ;;  %v1256_v9 = vrot.slane %v1213_v2, 4  ;;  %v1266_v29 = vpack.c.bf16 %v1243_v27, %v1243_v27  ;;  %v4657_v27 = vld [vmem:[%s6069_s8 + $0xc4] ss:$16 sps:$4 sm:$0xff]  }
 0x4b9   : > { %v1308_v33 = vsel %vm961_vm5, %v1301_v7, %v1307_v48  ;;  %v1426_v7 = vrot.slane %v5153_v40, %v5234_v14  ;;  %v4695_v40 = vld [vmem:[%s6071_s10 + $0x138] sm:$0xff]   ;;  %v4696_v48 = vld [vmem:[%s6071_s10 + $0x170] sm:$0xff]  }
 0x4ba   : > { %v1249_v16 = vadd.f32 %v1248_v6, %v1247_v59  ;;  %v1253_v18 = vadd.f32 %v1252_v8, %v1251_v60  ;;  %v1257_v19 = vadd.f32 %v1256_v9, %v1213_v2  ;;  %v1302_v45 = vunpack.c.l.b16 %v1266_v29  ;;  %v4649_v6 = vld [vmem:[%s6069_s8 + $0xe0] ss:$16 sps:$4 sm:$0xff]   ;;  %v4654_v8 = vld [vmem:[%s6069_s8 + $0x44] ss:$16 sps:$4 sm:$0xff]   ;;  %v4672_v29 = vld [vmem:[%s6069_s8 + $0x6c] ss:$16 sps:$4 sm:$0xff]  }
 0x4bb   : > { %v4652_v9 = vld [vmem:[%s6069_s8 + $0x40] ss:$16 sps:$4 sm:$0xff]  }
 0x4bc   : > { %v1254_v26 = vrot.slane %v1253_v18, 1  ;;  %v1258_v28 = vrot.slane %v1257_v19, 2  ;;  %v1267_v36 = vpack.c.bf16 %v1249_v16, %v1249_v16  ;;  %v1309_v32 = vsel %vm963_vm6, %v1302_v45, %v1308_v33  ;;  %v4660_v16 = vld [vmem:[%s6069_s8 + $0x24] ss:$16 sps:$4 sm:$0xff]   ;;  %v4678_v33 = vld [vmem:[%s6069_s8 + $0x2c] ss:$16 sps:$4 sm:$0xff]  }
 0x4be   : > { %v1255_v30 = vadd.f32 %v1254_v26, %v1253_v18  ;;  %v1259_v37 = vadd.f32 %v1258_v28, %v1257_v19  ;;  %v1303_v62 = vunpack.c.l.b16 %v1267_v36  ;;  %v4658_v18 = vld [vmem:[%s6069_s8 + $0x20] ss:$16 sps:$4 sm:$0xff]   ;;  %v4663_v19 = vld [vmem:[%s6069_s8 + $0xa4] ss:$16 sps:$4 sm:$0xff]  }
 0x4bf   : > { %v4669_v26 = vld [vmem:[%s6069_s8 + $0x84] ss:$16 sps:$4 sm:$0xff]   ;;  %v4667_v28 = vld [vmem:[%s6069_s8 + $0x80] ss:$16 sps:$4 sm:$0xff]  }
 0x4c0   : > { %v1268_v56 = vpack.c.bf16 %v1255_v30, %v1255_v30  ;;  %v1260_v42 = vrot.slane %v1259_v37, 1  ;;  %v1310_v52 = vsel %vm965_vm7, %v1303_v62, %v1309_v32  ;;  %v4698_v32 = vld [vmem:[%s6071_s10 + $0x168] sm:$0xff]  }
 0x4c2   : > { %v1261_v47 = vadd.f32 %v1260_v42, %v1259_v37  ;;  %v1304_v49 = vunpack.c.l.b16 %v1268_v56 }
 0x4c4   : > { %v1269_v12 = vpack.c.bf16 %v1261_v47, %v1261_v47  ;;  %v1311_v34 = vsel %vm967_vm8, %v1304_v49, %v1310_v52  ;;  %v4675_v47 = vld [vmem:[%s6069_s8 + $0x4c] ss:$16 sps:$4 sm:$0xff]   ;;  %v4673_v49 = vld [vmem:[%s6069_s8 + $0x48] ss:$16 sps:$4 sm:$0xff]  }
 0x4c5   : > { %v4676_v52 = vld [vmem:[%s6069_s8 + $0x28] ss:$16 sps:$4 sm:$0xff]  }
 0x4c6   : > { %v1305_v53 = vunpack.c.l.b16 %v1269_v12  ;;  %v4697_v12 = vld [vmem:[%s6071_s10 + $0x130] sm:$0xff]  }
 0x4c8   : > { %v1312_v61 = vsel %vm969_vm9, %v1305_v53, %v1311_v34  ;;  %v4681_v53 = vld [vmem:[%s6069_s8 + $0xc] ss:$16 sps:$4 sm:$0xff]  }
 0x4c9   : > { %v1313_v50 = vpack.c.b16 %v1312_v61, %v1312_v61  ;;  %v4699_v34 = vld [vmem:[%s6071_s10 + $0x128] sm:$0xff]   ;;  %v4700_v61 = vld [vmem:[%s6071_s10 + $0x160] sm:$0xff]  }
 0x4cb   : > { %4572 = vmatmul.mubr.bf16.vlgmr.msra.gmra.mxu1 %v1313_v50  ;;  %v4679_v50 = vld [vmem:[%s6069_s8 + $0x8] ss:$16 sps:$4 sm:$0xff]  }
 0x4cc   : > { %1856 = vmatprep.mubr.bf16.mxu1 %v4962_v10  ;;  %1833 = vmatpush1.bf16.msra.mxu1 %v4649_v6  ;;  %v4710_v6 = vld [vmem:[%s6071_s10 + $0x1f8] sm:$0xff]  }
 0x4cd   : > { %1834 = vmatprep.subr.bf16.mxu1 %v4657_v27  ;;  %v4712_v27 = vld [vmem:[%s6071_s10 + $0x78] sm:$0xff]  }
 0x4d0   : > { %1835 = vmatpush1.bf16.msra.mxu1 %v4655_v15  ;;  %v4714_v15 = vld [vmem:[%s6071_s10 + $0x1f0] sm:$0xff]  }
 0x4d1   : > { %1836 = vmatprep.subr.bf16.mxu1 %v4663_v19  ;;  %v4719_v19 = vld [vmem:[%s6071_s10 + $0x1a8] sm:$0xff]  }
 0x4d4   : > { %1837 = vmatpush1.bf16.msra.mxu1 %v4661_v21  ;;  %v4722_v21 = vld [vmem:[%s6071_s10 + $0x1e0] sm:$0xff]  }
 0x4d5   : > { %1838 = vmatprep.subr.bf16.mxu1 %v4669_v26  ;;  %v4727_v26 = vld [vmem:[%s6071_s10 + $0x198] sm:$0xff]  }
 0x4d8   : > { %1839 = vmatpush1.bf16.msra.mxu1 %v4667_v28  ;;  %v4730_v28 = vld [vmem:[%s6071_s10 + $0x1d0] sm:$0xff]  }
 0x4d9   : > { %4346 = vmatprep.subr.bf16.mxu1 %v4694_v35  ;;  %v4734_v35 = vld [vmem:[%s6071_s10 + $0x1c8] sm:$0xff]  }
 0x58b   : > { %v1397_v51 = vpop.f32.mrf.mxu1 }
 0x58c   : > { %v1398_v17 = vadd.f32 %v1397_v51, %v1289_v63  ;;  %v4684_v63 = vld [vmem:[%s6069_s8 + $0xec] ss:$16 sps:$4 sm:$0xff]   ;;  %v4701_v51 = vld [vmem:[%s6071_s10 + $0x120] sm:$0xff]  }
 0x58d   : > { %v4573_v54 = vpop.f32.mrf.mxu1 }
 0x58e   : > { %v1403_v0 = vadd.f32 %v1398_v17, %v5139_v23  ;;  %v4646_v23 = vld [vmem:[%s6069_s8 + $0x60] ss:$16 sps:$4 sm:$0xff]   ;;  %v4702_v17 = vld [vmem:[%s6071_s10 + $0x158] sm:$0xff]  }
 0x58f   : > { %v1400_v55 = vpop.f32.mrf.mxu1  ;;  %1559 = vmatpush1.bf16.msra.mxu0 %v4646_v23  ;;  %v4682_v54 = vld [vmem:[%s6069_s8 + $0xe8] ss:$16 sps:$4 sm:$0xff]  }
 0x590   : > { %v1404_v57 = vsel %vm749_vm2, %v1403_v0, 0.0  ;;  %1560 = vmatprep.subr.bf16.mxu0 %v4654_v8  ;;  %v4703_v55 = vld [vmem:[%s6071_s10 + $0x118] sm:$0xff]   ;;  %v4707_v23 = vld [vmem:[%s6071_s10 + $0x108] sm:$0xff]   ;;  %v4709_v8 = vld [vmem:[%s6071_s10 + $0x100] sm:$0xff]  }
 0x591   : > { %1405 = vadd.xlane.f32.xlu1 %v1404_v57  ;;  %v4574_v58 = vpop.f32.mrf.mxu1  ;;  %v4704_v57 = vld [vmem:[%s6071_s10 + $0x150] sm:$0xff]  }
 0x592   : > { %v4685_v58 = vld [vmem:[%s6069_s8 + $0xc8] ss:$16 sps:$4 sm:$0xff]  }
 0x593   : > { %1561 = vmatpush1.bf16.msra.mxu0 %v4652_v9  ;;  %v4711_v9 = vld [vmem:[%s6071_s10 + $0x1b8] sm:$0xff]  }
 0x594   : > { %1562 = vmatprep.subr.bf16.mxu0 %v4660_v16  ;;  %v4715_v16 = vld [vmem:[%s6071_s10 + $0x1b0] sm:$0xff]  }
 0x597   : > { %1563 = vmatpush1.bf16.msra.mxu0 %v4658_v18  ;;  %v4718_v18 = vld [vmem:[%s6071_s10 + $0x1e8] sm:$0xff]  }
 0x598   : > { %1564 = vmatprep.subr.bf16.mxu0 %v4666_v24  ;;  %v4723_v24 = vld [vmem:[%s6071_s10 + $0x1a0] sm:$0xff]  }
 0x59b   : > { %1565 = vmatpush1.bf16.msra.mxu0 %v4664_v25  ;;  %v4726_v25 = vld [vmem:[%s6071_s10 + $0x1d8] sm:$0xff]  }
 0x59c   : > { %1599 = vmatprep.subr.bf16.mxu0 %v4672_v29  ;;  %v4731_v29 = vld [vmem:[%s6071_s10 + $0x190] sm:$0xff]  }
 0x61a   : > { %v1406_v22 = vpop.xlane.xlu1 %1405 }
 0x61b   : > { %v1408_v59 = vmul.f32 0.015625, %v1406_v22  ;;  %v4690_v22 = vld [vmem:[%s6069_s8 + $0xac] ss:$16 sps:$4 sm:$0xff]  }
 0x61d   : > { %v1409_v60 = vsub.f32 %v1403_v0, %v1408_v59  ;;  %v4687_v0 = vld [vmem:[%s6069_s8 + $0xcc] ss:$16 sps:$4 sm:$0xff]   ;;  %v4705_v59 = vld [vmem:[%s6071_s10 + $0x110] sm:$0xff]  }
 0x61f   : > { %v1410_v2 = vmul.f32 %v1409_v60, %v1409_v60 }
 0x621   : > { %v1411_v3 = vsel %vm749_vm2, %v1410_v2, 0.0  ;;  %v4693_v2 = vld [vmem:[%s6069_s8 + $0x8c] ss:$16 sps:$4 sm:$0xff]  }
 0x622   : > { %1412 = vadd.xlane.f32.xlu0 %v1411_v3  ;;  %v4691_v3 = vld [vmem:[%s6069_s8 + $0x88] ss:$16 sps:$4 sm:$0xff]  }
 0x6ab   : > { %v1413_v36 = vpop.xlane.xlu0 %1412 }
 0x6ac   : > { %v1414_v30 = vmul.f32 0.015625, %v1413_v36  ;;  %v4735_v36 = vld [vmem:[%s6071_s10 + $0x188] sm:$0xff]  }
 0x6ae   : > { %v1415_v37 = vadd.f32 1e-05, %v1414_v30  ;;  %v4738_v30 = vld [vmem:[%s6071_s10 + $0x1c0] sm:$0xff]  }
 0x6b0   : > { %4892 = vrsqrt.f32 %v1415_v37  ;;  %v4739_v37 = vld [vmem:[%s6071_s10 + $0x180] sm:$0xff]  }
 0x6bd   : > { %v4893_v39 = vpop.eup %4892 }
 0x6be   : > { %v1417_v56 = vmul.f32 %v4893_v39, %v1409_v60  ;;  %v4688_v60 = vld [vmem:[%s6069_s8 + $0xa8] ss:$16 sps:$4 sm:$0xff]   ;;  %v5553_v39 = vld [vmem:[%s6070_s9 + $0x4] sm:$0xf] }
 0x6c0   : > { %v1422_v42 = vmul.f32 %v1421_v44, %v1417_v56  ;;  %v4742_v44 = vld [vmem:[%s6071_s10 + $0xf8] sm:$0xff]   ;;  %v5560_v56 = vld [vmem:[%s6070_s9] sm:$0xf] }
 0x6c2   : > { %v5390_v45 = vadd.f32 %v1426_v7, %v1422_v42  ;;  %v1727_v7 = vrot.slane %v5553_v39, %v5148_v38  ;;  %v1454_v42 = vrot.slane %v5560_v56, %v5228_v11 }
 0x6c4   : > { %v5397_v62 = vpack.c.bf16 %v5390_v45, %v5390_v45 }
 0x6c6   : > { %3889 = vmatmul.mubr.msk.bf16.vlgmr.msra.gmra.mxu0 %vm749_vm2, %v5397_v62  ;;  %3924 = vmatmul.mubr.msk.bf16.vlgmr.msra.gmra.mxu1 %vm749_vm2, %v5397_v62 }
 0x6c7   : > { %1600 = vmatpush1.bf16.msra.mxu0 %v4670_v46  ;;  %1623 = vmatprep.mubr.bf16.mxu0 %v4962_v10  ;;  %v1731_v46 = vrot.slane %v5553_v39, %v5228_v11 }
 0x6c8   : > { %1601 = vmatprep.subr.bf16.mxu0 %v4675_v47  ;;  %4347 = vmatpush3.bf16.msra.mxu1 %v4695_v40 }
 0x6c9   : > { %4348 = vmatprep.subr.bf16.mxu1 %v4696_v48 }
 0x6cb   : > { %1602 = vmatpush1.bf16.msra.mxu0 %v4673_v49 }
 0x6cc   : > { %1603 = vmatprep.subr.bf16.mxu0 %v4678_v33  ;;  %4349 = vmatpush3.bf16.msra.mxu1 %v4697_v12 }
 0x6cd   : > { %4350 = vmatprep.subr.bf16.mxu1 %v4698_v32 }
 0x6cf   : > { %1604 = vmatpush1.bf16.msra.mxu0 %v4676_v52 }
 0x6d0   : > { %1605 = vmatprep.subr.bf16.mxu0 %v4681_v53  ;;  %4351 = vmatpush3.bf16.msra.mxu1 %v4699_v34 }
 0x6d1   : > { %4352 = vmatprep.subr.bf16.mxu1 %v4700_v61 }
 0x6d3   : > { %1606 = vmatpush1.bf16.msra.mxu0 %v4679_v50 }
 0x6d4   : > { %1873 = vmatprep.subr.bf16.mxu0 %v4684_v63  ;;  %4353 = vmatpush3.bf16.msra.mxu1 %v4701_v51 }
 0x6d5   : > { %4354 = vmatprep.subr.bf16.mxu1 %v4702_v17 }
 0x6d6   : > { %3890 = vmatmul.mubr.msk.bf16.vlgmr.msra.gmra.mxu0 %vm749_vm2, %v5397_v62 }
 0x6d7   : > { %1874 = vmatpush1.bf16.msra.mxu0 %v4682_v54  ;;  %1897 = vmatprep.mubr.bf16.mxu0 %v4962_v10  ;;  %v4713_v54 = vld [vmem:[%s6071_s10 + $0x38] sm:$0xff]  }
 0x6d8   : > { %1875 = vmatprep.subr.bf16.mxu0 %v4687_v0  ;;  %4355 = vmatpush3.bf16.msra.mxu1 %v4703_v55  ;;  %v4716_v55 = vld [vmem:[%s6071_s10 + $0x70] sm:$0xff]  }
 0x6d9   : > { %4356 = vmatprep.subr.bf16.mxu1 %v4704_v57 }
 0x6db   : > { %1876 = vmatpush1.bf16.msra.mxu0 %v4685_v58  ;;  %v4717_v58 = vld [vmem:[%s6071_s10 + $0x30] sm:$0xff]  }
 0x6dc   : > { %1877 = vmatprep.subr.bf16.mxu0 %v4690_v22  ;;  %4357 = vmatpush3.bf16.msra.mxu1 %v4705_v59  ;;  %v4720_v22 = vld [vmem:[%s6071_s10 + $0x68] sm:$0xff]  }
 0x6dd   : > { %4358 = vmatprep.subr.bf16.mxu1 %v4706_v4  ;;  %v4721_v59 = vld [vmem:[%s6071_s10 + $0x28] sm:$0xff]   ;;  %v4725_v4 = vld [vmem:[%s6071_s10 + $0x20] sm:$0xff]  }
 0x6df   : > { %1878 = vmatpush1.bf16.msra.mxu0 %v4688_v60 }
 0x6e0   : > { %1879 = vmatprep.subr.bf16.mxu0 %v4693_v2  ;;  %4359 = vmatpush3.bf16.msra.mxu1 %v4707_v23  ;;  %v4724_v2 = vld [vmem:[%s6071_s10 + $0x60] sm:$0xff]  }
 0x6e1   : > { %4360 = vmatprep.subr.bf16.mxu1 %v4708_v5  ;;  %v4728_v5 = vld [vmem:[%s6071_s10 + $0x58] sm:$0xff]  }
 0x6e3   : > { %1880 = vmatpush1.bf16.msra.mxu0 %v4691_v3 }
 0x6e4   : > { %4368 = vmatprep.subr.bf16.mxu0 %v4710_v6  ;;  %4361 = vmatpush3.bf16.msra.mxu1 %v4709_v8  ;;  %v4729_v8 = vld [vmem:[%s6071_s10 + $0x18] sm:$0xff]  }
 0x6e5   : > { %4390 = vmatprep.subr.bf16.mxu1 %v4712_v27  ;;  %v4733_v27 = vld [vmem:[%s6071_s10 + $0x10] sm:$0xff]  }
 0x6e6   : > { %3925 = vmatmul.mubr.msk.bf16.vlgmr.msra.gmra.mxu0 %vm749_vm2, %v5397_v62 }
 0x6e7   : > { %4369 = vmatpush3.bf16.msra.mxu0 %v4711_v9  ;;  %v4732_v9 = vld [vmem:[%s6071_s10 + $0x50] sm:$0xff]  }
 0x6e8   : > { %4370 = vmatprep.subr.bf16.mxu0 %v4714_v15  ;;  %v1450_v15 = vrot.slane %v5560_v56, %v5148_v38 }
 0x6eb   : > { %4371 = vmatpush3.bf16.msra.mxu0 %v4715_v16  ;;  %v4736_v16 = vld [vmem:[%s6071_s10 + $0x48] sm:$0xff]  }
 0x6ec   : > { %4372 = vmatprep.subr.bf16.mxu0 %v4718_v18  ;;  %v1462_v18 = vrot.slane %v5560_v56, %v5234_v14 }
 0x6ef   : > { %4373 = vmatpush3.bf16.msra.mxu0 %v4719_v19  ;;  %v1735_v19 = vrot.slane %v5553_v39, %v5231_v13 }
 0x6f0   : > { %4374 = vmatprep.subr.bf16.mxu0 %v4722_v21  ;;  %v1739_v21 = vrot.slane %v5553_v39, %v5234_v14 }
 0x6f3   : > { %4375 = vmatpush3.bf16.msra.mxu0 %v4723_v24  ;;  %v4737_v24 = vld [vmem:[%s6071_s10 + $0x8] sm:$0xff]  }
 0x6f4   : > { %4376 = vmatprep.subr.bf16.mxu0 %v4726_v25 }
 0x6f7   : > { %4377 = vmatpush3.bf16.msra.mxu0 %v4727_v26 }
 0x6f8   : > { %4378 = vmatprep.subr.bf16.mxu0 %v4730_v28  ;;  %v4740_v28 = vld [vmem:[%s6071_s10 + $0x40] sm:$0xff]  }
 0x6fb   : > { %4379 = vmatpush3.bf16.msra.mxu0 %v4731_v29 }
 0x6fc   : > { %4380 = vmatprep.subr.bf16.mxu0 %v4734_v35 }
 0x6ff   : > { %4381 = vmatpush3.bf16.msra.mxu0 %v4735_v36 }
 0x700   : > { %4382 = vmatprep.subr.bf16.mxu0 %v4738_v30 }
 0x703   : > { %4383 = vmatpush3.bf16.msra.mxu0 %v4739_v37  ;;  %v4741_v37 = vld [vmem:[%s6071_s10] sm:$0xff]  }
 0x704   : > { %4412 = vmatprep.subr.bf16.mxu0 %v4742_v44 }
 0x786   : > { %v1584_v47 = vpop.f32.mrf.mxu0  ;;  %v1858_v40 = vpop.f32.mrf.mxu1 }
 0x787   : > { %v1859_v48 = vadd.f32 %v1858_v40, %v1727_v7  ;;  %v1585_v25 = vadd.f32 %v1584_v47, %v1450_v15 }
 0x788   : > { %v1586_v49 = vpop.f32.mrf.mxu0  ;;  %v1860_v33 = vpop.f32.mrf.mxu1 }
 0x789   : > { %v1587_v12 = vadd.f32 %v1586_v49, %v1454_v42  ;;  %v1861_v32 = vadd.f32 %v1860_v33, %v1731_v46  ;;  %v1906_v52 = vmax.f32 %v1859_v48, 0.0  ;;  %v1632_v44 = vmax.f32 %v1585_v25, 0.0  ;;  %v4746_v42 = vld [vmem:[%s6069_s8 + $0x164] ss:$16 sps:$4 sm:$0xff]   ;;  %v4743_v49 = vld [vmem:[%s6071_s10 + $0xb8] sm:$0xff]  }
 0x78a   : > { %v1588_v53 = vpop.f32.mrf.mxu0  ;;  %v1862_v34 = vpop.f32.mrf.mxu1  ;;  %v4782_v25 = vld [vmem:[%s6071_s10 + $0x278] sm:$0xff]  }
 0x78b   : > { %v1633_v61 = vmax.f32 %v1587_v12, 0.0  ;;  %v1907_v50 = vmax.f32 %v1861_v32, 0.0  ;;  %v1910_v0 = vpack.c.bf16 %v1906_v52, %v1906_v52  ;;  %v1636_v33 = vpack.c.bf16 %v1632_v44, %v1632_v44  ;;  %v4744_v32 = vld [vmem:[%s6069_s8 + $0x160] ss:$16 sps:$4 sm:$0xff]   ;;  %v4751_v34 = vld [vmem:[%s6069_s8 + $0x144] ss:$16 sps:$4 sm:$0xff]  }
 0x78c   : > { %v1589_v63 = vpop.f32.mrf.mxu0  ;;  %v1863_v51 = vpop.f32.mrf.mxu1  ;;  %v4747_v52 = vld [vmem:[%s6071_s10 + $0xf0] sm:$0xff]   ;;  %v4789_v44 = vld [vmem:[%s6071_s10 + $0x220] sm:$0xff]  }
 0x78d   : > { %v1911_v17 = vpack.c.bf16 %v1907_v50, %v1907_v50  ;;  %v1637_v57 = vpack.c.bf16 %v1633_v61, %v1633_v61  ;;  %v4748_v61 = vld [vmem:[%s6071_s10 + $0xb0] sm:$0xff]   ;;  %v4752_v63 = vld [vmem:[%s6071_s10 + $0xe8] sm:$0xff]  }
 0x78e   : > { %v4749_v50 = vld [vmem:[%s6069_s8 + $0x140] ss:$16 sps:$4 sm:$0xff]   ;;  %v4756_v51 = vld [vmem:[%s6069_s8 + $0x124] ss:$16 sps:$4 sm:$0xff]  }
 0x78f   : > { %2203 = vmatprep.mubr.bf16.mxu1 %v1911_v17  ;;  %v4753_v17 = vld [vmem:[%s6071_s10 + $0xa8] sm:$0xff]  }
 0x790   : > { %2204 = vmatmul.mubr.bf16.vlgmr.msra.gmra.mxu1 %v1910_v0  ;;  %v4757_v0 = vld [vmem:[%s6071_s10 + $0xe0] sm:$0xff]  }
 0x791   : > { %4391 = vmatpush3.bf16.msra.mxu1 %v4713_v54  ;;  %2475 = vmatprep.mubr.bf16.mxu1 %v1637_v57  ;;  %v4754_v54 = vld [vmem:[%s6069_s8 + $0x120] ss:$16 sps:$4 sm:$0xff]  }
 0x792   : > { %4392 = vmatprep.subr.bf16.mxu1 %v4716_v55  ;;  %v4761_v55 = vld [vmem:[%s6069_s8 + $0x104] ss:$16 sps:$4 sm:$0xff]  }
 0x793   : > { %v4758_v57 = vld [vmem:[%s6071_s10 + $0xa0] sm:$0xff]  }
 0x795   : > { %4393 = vmatpush3.bf16.msra.mxu1 %v4717_v58  ;;  %v4759_v58 = vld [vmem:[%s6069_s8 + $0x100] ss:$16 sps:$4 sm:$0xff]  }
 0x796   : > { %v5581_v60 = vpop.f32.mrf.mxu0  ;;  %4394 = vmatprep.subr.bf16.mxu1 %v4720_v22  ;;  %v4762_v22 = vld [vmem:[%s6071_s10 + $0xd8] sm:$0xff]  }
 0x798   : > { %v1627_v3 = vpop.f32.mrf.mxu0 }
 0x799   : > { %4395 = vmatpush3.bf16.msra.mxu1 %v4721_v59  ;;  %v1628_v29 = vadd.f32 %v1627_v3, %v1462_v18  ;;  %v4763_v59 = vld [vmem:[%s6071_s10 + $0x98] sm:$0xff]   ;;  %v4765_v3 = vld [vmem:[%s6071_s10 + $0x90] sm:$0xff]  }
 0x79a   : > { %v1629_v23 = vpop.f32.mrf.mxu0  ;;  %4396 = vmatprep.subr.bf16.mxu1 %v4724_v2  ;;  %v4764_v2 = vld [vmem:[%s6071_s10 + $0xd0] sm:$0xff]   ;;  %v4773_v18 = vld [vmem:[%s6069_s8 + $0x148] ss:$16 sps:$4 sm:$0xff]  }
 0x79b   : > { %v1635_v46 = vmax.f32 %v1628_v29, 0.0  ;;  %v4766_v23 = vld [vmem:[%s6071_s10 + $0xc8] sm:$0xff]  }
 0x79c   : > { %v1630_v6 = vpop.f32.mrf.mxu0  ;;  %v4779_v29 = vld [vmem:[%s6069_s8 + $0x108] ss:$16 sps:$4 sm:$0xff]  }
 0x79d   : > { %4397 = vmatpush3.bf16.msra.mxu1 %v4725_v4  ;;  %v1639_v53 = vpack.c.bf16 %v1635_v46, %v1635_v46  ;;  %v1458_v4 = vrot.slane %v5560_v56, %v5231_v13  ;;  %v4769_v56 = vld [vmem:[%s6071_s10 + $0x80] sm:$0xff]   ;;  %v4793_v46 = vld [vmem:[%s6071_s10 + $0x210] sm:$0xff]  }
 0x79e   : > { %4398 = vmatprep.subr.bf16.mxu1 %v4728_v5  ;;  %v4767_v5 = vld [vmem:[%s6071_s10 + $0x88] sm:$0xff]  }
 0x79f   : > { %v1626_v6 = vadd.f32 %v5581_v60, %v1458_v4  ;;  %v4770_v60 = vld [vmem:[%s6069_s8 + $0x168] ss:$16 sps:$4 sm:$0xff]  }
 0x7a1   : > { %4399 = vmatpush3.bf16.msra.mxu1 %v4729_v8  ;;  %v4768_v8 = vld [vmem:[%s6071_s10 + $0xc0] sm:$0xff]  }
 0x7a2   : > { %4400 = vmatprep.subr.bf16.mxu1 %v4732_v9  ;;  %v1634_v9 = vmax.f32 %v1626_v6, 0.0 }
 0x7a4   : > { %v1638_v15 = vpack.c.bf16 %v1634_v9, %v1634_v9 }
 0x7a5   : > { %4401 = vmatpush3.bf16.msra.mxu1 %v4733_v27  ;;  %v4772_v27 = vld [vmem:[%s6069_s8 + $0x16c] ss:$16 sps:$4 sm:$0xff]  }
 0x7a6   : > { %v1899_v26 = vpop.f32.mrf.mxu0  ;;  %4402 = vmatprep.subr.bf16.mxu1 %v4736_v16  ;;  %v4775_v16 = vld [vmem:[%s6069_s8 + $0x14c] ss:$16 sps:$4 sm:$0xff]  }
 0x7a7   : > { %v1900_v35 = vadd.f32 %v1899_v26, %v1735_v19  ;;  %v4778_v19 = vld [vmem:[%s6069_s8 + $0x12c] ss:$16 sps:$4 sm:$0xff]  }
 0x7a8   : > { %v1901_v36 = vpop.f32.mrf.mxu0  ;;  %v4783_v26 = vld [vmem:[%s6071_s10 + $0x238] sm:$0xff]  }
 0x7a9   : > { %v1902_v30 = vadd.f32 %v1901_v36, %v1739_v21  ;;  %4403 = vmatpush3.bf16.msra.mxu1 %v4737_v24  ;;  %v1908_v39 = vmax.f32 %v1900_v35, 0.0  ;;  %v4776_v21 = vld [vmem:[%s6069_s8 + $0x128] ss:$16 sps:$4 sm:$0xff]   ;;  %v4781_v24 = vld [vmem:[%s6069_s8 + $0x10c] ss:$16 sps:$4 sm:$0xff]   ;;  %v4785_v35 = vld [vmem:[%s6071_s10 + $0x230] sm:$0xff]  }
 0x7aa   : > { %v1903_v7 = vpop.f32.mrf.mxu0  ;;  %4404 = vmatprep.subr.bf16.mxu1 %v4740_v28  ;;  %v4784_v28 = vld [vmem:[%s6071_s10 + $0x270] sm:$0xff]   ;;  %v4786_v36 = vld [vmem:[%s6071_s10 + $0x268] sm:$0xff]  }
 0x7ab   : > { %v1909_v47 = vmax.f32 %v1902_v30, 0.0  ;;  %v1912_v12 = vpack.c.bf16 %v1908_v39, %v1908_v39  ;;  %v4787_v30 = vld [vmem:[%s6071_s10 + $0x228] sm:$0xff]   ;;  %v4790_v39 = vld [vmem:[%s6071_s10 + $0x258] sm:$0xff]  }
 0x7ac   : > { %v1904_v40 = vpop.f32.mrf.mxu0  ;;  %v4791_v7 = vld [vmem:[%s6071_s10 + $0x218] sm:$0xff]  }
 0x7ad   : > { %v1913_v48 = vpack.c.bf16 %v1909_v47, %v1909_v47  ;;  %4405 = vmatpush3.bf16.msra.mxu1 %v4741_v37  ;;  %v4788_v37 = vld [vmem:[%s6071_s10 + $0x260] sm:$0xff]   ;;  %v4794_v47 = vld [vmem:[%s6071_s10 + $0x248] sm:$0xff]  }
 0x7ae   : > { %2651 = vmatprep.subr.bf16.mxu1 %v4746_v42  ;;  %v4792_v42 = vld [vmem:[%s6071_s10 + $0x250] sm:$0xff]   ;;  %v4795_v40 = vld [vmem:[%s6071_s10 + $0x208] sm:$0xff]  }
 0x7af   : > { %2243 = vmatprep.mubr.bf16.mxu0 %v1913_v48  ;;  %v4796_v48 = vld [vmem:[%s6071_s10 + $0x240] sm:$0xff]  }
 0x7b0   : > { %2244 = vmatmul.mubr.bf16.vlgmr.msra.gmra.mxu0 %v1912_v12  ;;  %2476 = vmatmul.mubr.bf16.vlgmr.msra.gmra.mxu1 %v1636_v33  ;;  %v4798_v33 = vld [vmem:[%s6071_s10 + $0x2f8] sm:$0xff]  }
 0x7b1   : > { %4413 = vmatpush3.bf16.msra.mxu0 %v4743_v49  ;;  %2515 = vmatprep.mubr.bf16.mxu0 %v1639_v53  ;;  %v4797_v49 = vld [vmem:[%s6071_s10 + $0x200] sm:$0xff]   ;;  %v4799_v12 = vld [vmem:[%s6071_s10 + $0x2b8] sm:$0xff]   ;;  %v4804_v53 = vld [vmem:[%s6071_s10 + $0x2b0] sm:$0xff]  }
 0x7b2   : > { %2652 = vmatpush1.bf16.msra.mxu1 %v4744_v32  ;;  %4414 = vmatprep.subr.bf16.mxu0 %v4747_v52  ;;  %v4802_v32 = vld [vmem:[%s6069_s8 + $0x1e4] ss:$16 sps:$4 sm:$0xff]  }
 0x7b3   : > { %2653 = vmatprep.subr.bf16.mxu1 %v4751_v34  ;;  %2675 = vmatprep.mubr.bf16.mxu1 %v4962_v10  ;;  %v4803_v52 = vld [vmem:[%s6071_s10 + $0x2f0] sm:$0xff]   ;;  %v4808_v34 = vld [vmem:[%s6071_s10 + $0x2e8] sm:$0xff]  }
 0x7b5   : > { %4415 = vmatpush3.bf16.msra.mxu0 %v4748_v61  ;;  %v4809_v61 = vld [vmem:[%s6071_s10 + $0x2a8] sm:$0xff]  }
 0x7b6   : > { %2654 = vmatpush1.bf16.msra.mxu1 %v4749_v50  ;;  %4416 = vmatprep.subr.bf16.mxu0 %v4752_v63  ;;  %v4813_v50 = vld [vmem:[%s6071_s10 + $0x2e0] sm:$0xff]  }
 0x7b7   : > { %2655 = vmatprep.subr.bf16.mxu1 %v4756_v51  ;;  %v4814_v63 = vld [vmem:[%s6071_s10 + $0x2a0] sm:$0xff]   ;;  %v4818_v51 = vld [vmem:[%s6071_s10 + $0x2d8] sm:$0xff]  }
 0x7b9   : > { %4417 = vmatpush3.bf16.msra.mxu0 %v4753_v17  ;;  %v4819_v17 = vld [vmem:[%s6071_s10 + $0x298] sm:$0xff]  }
 0x7ba   : > { %2656 = vmatpush1.bf16.msra.mxu1 %v4754_v54  ;;  %4418 = vmatprep.subr.bf16.mxu0 %v4757_v0  ;;  %v4820_v54 = vld [vmem:[%s6071_s10 + $0x2d0] sm:$0xff]  }
 0x7bb   : > { %2657 = vmatprep.subr.bf16.mxu1 %v4761_v55  ;;  %v4821_v0 = vld [vmem:[%s6071_s10 + $0x290] sm:$0xff]   ;;  %v4822_v55 = vld [vmem:[%s6071_s10 + $0x2c8] sm:$0xff]  }
 0x7bd   : > { %4419 = vmatpush3.bf16.msra.mxu0 %v4758_v57  ;;  %v4823_v57 = vld [vmem:[%s6071_s10 + $0x288] sm:$0xff]  }
 0x7be   : > { %2658 = vmatpush1.bf16.msra.mxu1 %v4759_v58  ;;  %4420 = vmatprep.subr.bf16.mxu0 %v4762_v22  ;;  %v4824_v58 = vld [vmem:[%s6071_s10 + $0x2c0] sm:$0xff]  }
 0x7bf   : > { %4434 = vmatprep.subr.bf16.mxu1 %v4782_v25  ;;  %v4825_v22 = vld [vmem:[%s6071_s10 + $0x280] sm:$0xff]   ;;  %v4070_v25 = vld [vmem:[%s6070_s9 + $0x8] sm:$0xf] }
 0x7c1   : > { %4421 = vmatpush3.bf16.msra.mxu0 %v4763_v59  ;;  %4087 = vmatmul.mubr.msk.bf16.vlgmr.msra.gmra.mxu1 %vm749_vm2, %v5397_v62  ;;  %v4828_v59 = vld [vmem:[%s6069_s8 + $0x1ec] ss:$16 sps:$4 sm:$0xff]  }
 0x7c2   : > { %4422 = vmatprep.subr.bf16.mxu0 %v4764_v2  ;;  %4435 = vmatpush3.bf16.msra.mxu1 %v4783_v26  ;;  %v2546_v26 = vrot.slane %v4070_v25, %v5148_v38 }
 0x7c3   : > { %4436 = vmatprep.subr.bf16.mxu1 %v4784_v28  ;;  %v2550_v28 = vrot.slane %v4070_v25, %v5228_v11 }
 0x7c5   : > { %4423 = vmatpush3.bf16.msra.mxu0 %v4765_v3 }
 0x7c6   : > { %4424 = vmatprep.subr.bf16.mxu0 %v4766_v23  ;;  %4437 = vmatpush3.bf16.msra.mxu1 %v4785_v35 }
 0x7c7   : > { %4438 = vmatprep.subr.bf16.mxu1 %v4786_v36 }
 0x7c9   : > { %4425 = vmatpush3.bf16.msra.mxu0 %v4767_v5 }
 0x7ca   : > { %4426 = vmatprep.subr.bf16.mxu0 %v4768_v8  ;;  %4439 = vmatpush3.bf16.msra.mxu1 %v4787_v30 }
 0x7cb   : > { %4440 = vmatprep.subr.bf16.mxu1 %v4788_v37 }
 0x7cd   : > { %4427 = vmatpush3.bf16.msra.mxu0 %v4769_v56 }
 0x7ce   : > { %2692 = vmatprep.subr.bf16.mxu0 %v4772_v27  ;;  %4441 = vmatpush3.bf16.msra.mxu1 %v4789_v44 }
 0x7cf   : > { %4442 = vmatprep.subr.bf16.mxu1 %v4790_v39 }
 0x7d0   : > { %2516 = vmatmul.mubr.bf16.vlgmr.msra.gmra.mxu0 %v1638_v15 }
 0x7d1   : > { %2693 = vmatpush1.bf16.msra.mxu0 %v4770_v60  ;;  %2716 = vmatprep.mubr.bf16.mxu0 %v4962_v10 }
 0x7d2   : > { %2694 = vmatprep.subr.bf16.mxu0 %v4775_v16  ;;  %4443 = vmatpush3.bf16.msra.mxu1 %v4791_v7 }
 0x7d3   : > { %4444 = vmatprep.subr.bf16.mxu1 %v4792_v42 }
 0x7d5   : > { %2695 = vmatpush1.bf16.msra.mxu0 %v4773_v18 }
 0x7d6   : > { %2696 = vmatprep.subr.bf16.mxu0 %v4778_v19  ;;  %4445 = vmatpush3.bf16.msra.mxu1 %v4793_v46  ;;  %v4800_v46 = vld [vmem:[%s6069_s8 + $0x1e0] ss:$16 sps:$4 sm:$0xff]  }
 0x7d7   : > { %4446 = vmatprep.subr.bf16.mxu1 %v4794_v47 }
 0x7d9   : > { %2697 = vmatpush1.bf16.msra.mxu0 %v4776_v21 }
 0x7da   : > { %2698 = vmatprep.subr.bf16.mxu0 %v4781_v24  ;;  %4447 = vmatpush3.bf16.msra.mxu1 %v4795_v40  ;;  %v4807_v40 = vld [vmem:[%s6069_s8 + $0x1c4] ss:$16 sps:$4 sm:$0xff]  }
 0x7db   : > { %4448 = vmatprep.subr.bf16.mxu1 %v4796_v48  ;;  %v4805_v48 = vld [vmem:[%s6069_s8 + $0x1c0] ss:$16 sps:$4 sm:$0xff]  }
 0x7dd   : > { %2699 = vmatpush1.bf16.msra.mxu0 %v4779_v29 }
 0x7de   : > { %4456 = vmatprep.subr.bf16.mxu0 %v4798_v33  ;;  %4449 = vmatpush3.bf16.msra.mxu1 %v4797_v49  ;;  %v4812_v49 = vld [vmem:[%s6069_s8 + $0x1a4] ss:$16 sps:$4 sm:$0xff]  }
 0x7df   : > { %3199 = vmatprep.subr.bf16.mxu1 %v4802_v32  ;;  %v4817_v32 = vld [vmem:[%s6069_s8 + $0x184] ss:$16 sps:$4 sm:$0xff]  }
 0x7e0   : > { %4088 = vmatmul.mubr.msk.bf16.vlgmr.msra.gmra.mxu0 %vm749_vm2, %v5397_v62 }
 0x7e1   : > { %4457 = vmatpush3.bf16.msra.mxu0 %v4799_v12  ;;  %v4810_v12 = vld [vmem:[%s6069_s8 + $0x1a0] ss:$16 sps:$4 sm:$0xff]  }
 0x7e2   : > { %4458 = vmatprep.subr.bf16.mxu0 %v4803_v52 }
 0x7e5   : > { %4459 = vmatpush3.bf16.msra.mxu0 %v4804_v53 }
 0x7e6   : > { %4460 = vmatprep.subr.bf16.mxu0 %v4808_v34 }
 0x7e9   : > { %4461 = vmatpush3.bf16.msra.mxu0 %v4809_v61  ;;  %v4815_v61 = vld [vmem:[%s6069_s8 + $0x180] ss:$16 sps:$4 sm:$0xff]  }
 0x7ea   : > { %4462 = vmatprep.subr.bf16.mxu0 %v4813_v50 }
 0x7ed   : > { %4463 = vmatpush3.bf16.msra.mxu0 %v4814_v63  ;;  %v4838_v63 = vld [vmem:[%s6071_s10 + $0x378] sm:$0xff]  }
 0x7ee   : > { %4464 = vmatprep.subr.bf16.mxu0 %v4818_v51 }
 0x7f1   : > { %4465 = vmatpush3.bf16.msra.mxu0 %v4819_v17  ;;  %v4839_v17 = vld [vmem:[%s6071_s10 + $0x338] sm:$0xff]  }
 0x7f2   : > { %4466 = vmatprep.subr.bf16.mxu0 %v4820_v54  ;;  %v4840_v54 = vld [vmem:[%s6071_s10 + $0x370] sm:$0xff]  }
 0x7f5   : > { %4467 = vmatpush3.bf16.msra.mxu0 %v4821_v0  ;;  %v4841_v0 = vld [vmem:[%s6071_s10 + $0x330] sm:$0xff]  }
 0x7f6   : > { %4468 = vmatprep.subr.bf16.mxu0 %v4822_v55  ;;  %v2554_v55 = vrot.slane %v4070_v25, %v5231_v13 }
 0x7f9   : > { %4469 = vmatpush3.bf16.msra.mxu0 %v4823_v57  ;;  %v2558_v57 = vrot.slane %v4070_v25, %v5234_v14  ;;  %v4847_v25 = vld [vmem:[%s6071_s10 + $0x318] sm:$0xff]  }
 0x7fa   : > { %4470 = vmatprep.subr.bf16.mxu0 %v4824_v58 }
 0x7fd   : > { %4471 = vmatpush3.bf16.msra.mxu0 %v4825_v22 }
 0x7fe   : > { %3240 = vmatprep.subr.bf16.mxu0 %v4828_v59 }
 0x850   : > { %v4362_v2 = vpop.f32.mrf.mxu1 }
 0x852   : > { %v4363_v3 = vpop.f32.mrf.mxu1 }
 0x853   : > { %v4364_v4 = vadd.f32 %v4363_v3, %v4362_v2 }
 0x854   : > { %v4365_v23 = vpop.f32.mrf.mxu1 }
 0x856   : > { %v4366_v5 = vpop.f32.mrf.mxu1 }
 0x870   : > { %v4384_v6 = vpop.f32.mrf.mxu0  ;;  %v4406_v8 = vpop.f32.mrf.mxu1 }
 0x872   : > { %v4385_v56 = vpop.f32.mrf.mxu0  ;;  %v4407_v9 = vpop.f32.mrf.mxu1 }
 0x873   : > { %v4386_v27 = vadd.f32 %v4385_v56, %v4384_v6  ;;  %v4408_v60 = vadd.f32 %v4407_v9, %v4406_v8  ;;  %v4826_v8 = vld [vmem:[%s6069_s8 + $0x1e8] ss:$16 sps:$4 sm:$0xff]   ;;  %v4831_v9 = vld [vmem:[%s6069_s8 + $0x1cc] ss:$16 sps:$4 sm:$0xff]  }
 0x874   : > { %v4387_v15 = vpop.f32.mrf.mxu0  ;;  %v4409_v16 = vpop.f32.mrf.mxu1 }
 0x875   : > { %v2246_v18 = vadd.f32 %v4386_v27, %v4364_v4  ;;  %v4829_v27 = vld [vmem:[%s6069_s8 + $0x1c8] ss:$16 sps:$4 sm:$0xff]   ;;  %v4837_v16 = vld [vmem:[%s6069_s8 + $0x18c] ss:$16 sps:$4 sm:$0xff]  }
 0x876   : > { %v4388_v19 = vpop.f32.mrf.mxu0  ;;  %v4410_v21 = vpop.f32.mrf.mxu1  ;;  %v4832_v15 = vld [vmem:[%s6069_s8 + $0x1a8] ss:$16 sps:$4 sm:$0xff]  }
 0x877   : > { %v2478_v24 = vadd.f32 %v4408_v60, %v2246_v18  ;;  %v4834_v60 = vld [vmem:[%s6069_s8 + $0x1ac] ss:$16 sps:$4 sm:$0xff]   ;;  %v4844_v21 = vld [vmem:[%s6071_s10 + $0x360] sm:$0xff]  }
 0x878   : > { %v4842_v18 = vld [vmem:[%s6071_s10 + $0x368] sm:$0xff]  }
 0x879   : > { %v4843_v19 = vld [vmem:[%s6071_s10 + $0x328] sm:$0xff]  }
 0x881   : > { %v2677_v29 = vpop.f32.mrf.mxu1 }
 0x882   : > { %v2678_v35 = vadd.f32 %v2677_v29, %v2546_v26  ;;  %v4848_v26 = vld [vmem:[%s6071_s10 + $0x350] sm:$0xff]   ;;  %v4850_v29 = vld [vmem:[%s6071_s10 + $0x348] sm:$0xff]  }
 0x883   : > { %v2679_v36 = vpop.f32.mrf.mxu1 }
 0x884   : > { %v2680_v30 = vadd.f32 %v2679_v36, %v2550_v28  ;;  %v2725_v37 = vmax.f32 %v2678_v35, 0.0  ;;  %v4849_v28 = vld [vmem:[%s6071_s10 + $0x310] sm:$0xff]   ;;  %v4851_v35 = vld [vmem:[%s6071_s10 + $0x308] sm:$0xff]   ;;  %v4852_v36 = vld [vmem:[%s6071_s10 + $0x340] sm:$0xff]  }
 0x885   : > { %v2681_v44 = vpop.f32.mrf.mxu1 }
 0x886   : > { %v2726_v39 = vmax.f32 %v2680_v30, 0.0  ;;  %v2729_v47 = vpack.c.bf16 %v2725_v37, %v2725_v37  ;;  %v4853_v30 = vld [vmem:[%s6071_s10 + $0x300] sm:$0xff]   ;;  %v4854_v37 = vld [vmem:[%s6071_s10 + $0x3f8] sm:$0xff]  }
 0x887   : > { %v2682_v7 = vpop.f32.mrf.mxu1  ;;  %v4855_v44 = vld [vmem:[%s6071_s10 + $0x3b8] sm:$0xff]  }
 0x888   : > { %v2730_v42 = vpack.c.bf16 %v2726_v39, %v2726_v39  ;;  %v4856_v39 = vld [vmem:[%s6071_s10 + $0x3f0] sm:$0xff]  }
 0x889   : > { %v4857_v7 = vld [vmem:[%s6071_s10 + $0x3b0] sm:$0xff]  }
 0x88a   : > { %3022 = vmatprep.mubr.bf16.mxu1 %v2730_v42  ;;  %v4858_v42 = vld [vmem:[%s6071_s10 + $0x3e8] sm:$0xff]  }
 0x88b   : > { %3023 = vmatmul.mubr.bf16.vlgmr.msra.gmra.mxu1 %v2729_v47  ;;  %v4860_v47 = vld [vmem:[%s6071_s10 + $0x3e0] sm:$0xff]  }
 0x88c   : > { %3200 = vmatpush1.bf16.msra.mxu1 %v4800_v46  ;;  %3223 = vmatprep.mubr.bf16.mxu1 %v4962_v10  ;;  %v4859_v46 = vld [vmem:[%s6071_s10 + $0x3a8] sm:$0xff]  }
 0x88d   : > { %3201 = vmatprep.subr.bf16.mxu1 %v4807_v40  ;;  %v4861_v40 = vld [vmem:[%s6071_s10 + $0x3a0] sm:$0xff]  }
 0x890   : > { %3202 = vmatpush1.bf16.msra.mxu1 %v4805_v48  ;;  %v4428_v33 = vpop.f32.mrf.mxu0  ;;  %v4862_v48 = vld [vmem:[%s6071_s10 + $0x3d8] sm:$0xff]  }
 0x891   : > { %3203 = vmatprep.subr.bf16.mxu1 %v4812_v49  ;;  %v4863_v49 = vld [vmem:[%s6071_s10 + $0x398] sm:$0xff]  }
 0x892   : > { %v4429_v52 = vpop.f32.mrf.mxu0 }
 0x893   : > { %v4430_v53 = vadd.f32 %v4429_v52, %v4428_v33  ;;  %v4864_v33 = vld [vmem:[%s6071_s10 + $0x3d0] sm:$0xff]   ;;  %v4867_v52 = vld [vmem:[%s6071_s10 + $0x388] sm:$0xff]  }
 0x894   : > { %3204 = vmatpush1.bf16.msra.mxu1 %v4810_v12  ;;  %v4431_v34 = vpop.f32.mrf.mxu0  ;;  %v4865_v12 = vld [vmem:[%s6071_s10 + $0x390] sm:$0xff]  }
 0x895   : > { %v5852_v50 = vadd.f32 %v4430_v53, %v2478_v24  ;;  %3205 = vmatprep.subr.bf16.mxu1 %v4817_v32  ;;  %v4845_v24 = vld [vmem:[%s6071_s10 + $0x320] sm:$0xff]   ;;  %v4866_v32 = vld [vmem:[%s6071_s10 + $0x3c8] sm:$0xff]  }
 0x896   : > { %v4432_v51 = vpop.f32.mrf.mxu0  ;;  %v4868_v53 = vld [vmem:[%s6071_s10 + $0x3c0] sm:$0xff]  }
 0x897   : > { %v4869_v34 = vld [vmem:[%s6071_s10 + $0x380] sm:$0xff]  }
 0x898   : > { %3206 = vmatpush1.bf16.msra.mxu1 %v4815_v61 }
 0x899   : > { %4478 = vmatprep.subr.bf16.mxu1 %v4838_v63 }
 0x89b   : > { %4218 = vmatmul.mubr.msk.bf16.vlgmr.msra.gmra.mxu1 %vm749_vm2, %v5397_v62 }
 0x89c   : > { %4479 = vmatpush3.bf16.msra.mxu1 %v4839_v17 }
 0x89d   : > { %4480 = vmatprep.subr.bf16.mxu1 %v4840_v54 }
 0x8a0   : > { %v2718_v58 = vpop.f32.mrf.mxu0  ;;  %4481 = vmatpush3.bf16.msra.mxu1 %v4841_v0  ;;  %v4201_v0 = vld [vmem:[%s6070_s9 + $0xc] sm:$0xf] }
 0x8a1   : > { %v2719_v22 = vadd.f32 %v2718_v58, %v2554_v55  ;;  %4482 = vmatprep.subr.bf16.mxu1 %v4842_v18  ;;  %v3094_v55 = vrot.slane %v4201_v0, %v5148_v38 }
 0x8a2   : > { %v2720_v59 = vpop.f32.mrf.mxu0 }
 0x8a3   : > { %v2721_v2 = vadd.f32 %v2720_v59, %v2558_v57  ;;  %v2727_v3 = vmax.f32 %v2719_v22, 0.0  ;;  %v3098_v57 = vrot.slane %v4201_v0, %v5228_v11 }
 0x8a4   : > { %v2722_v4 = vpop.f32.mrf.mxu0  ;;  %4483 = vmatpush3.bf16.msra.mxu1 %v4843_v19 }
 0x8a5   : > { %v2728_v23 = vmax.f32 %v2721_v2, 0.0  ;;  %v2731_v56 = vpack.c.bf16 %v2727_v3, %v2727_v3  ;;  %4484 = vmatprep.subr.bf16.mxu1 %v4844_v21 }
 0x8a6   : > { %v2723_v5 = vpop.f32.mrf.mxu0 }
 0x8a7   : > { %v2732_v6 = vpack.c.bf16 %v2728_v23, %v2728_v23 }
 0x8a8   : > { %4485 = vmatpush3.bf16.msra.mxu1 %v4845_v24 }
 0x8a9   : > { %3062 = vmatprep.mubr.bf16.mxu0 %v2732_v6 }
 0x8aa   : > { %3063 = vmatmul.mubr.bf16.vlgmr.msra.gmra.mxu0 %v2731_v56 }
 0x8ab   : > { %3241 = vmatpush1.bf16.msra.mxu0 %v4826_v8  ;;  %3264 = vmatprep.mubr.bf16.mxu0 %v4962_v10  ;;  %v4835_v10 = vld [vmem:[%s6069_s8 + $0x188] ss:$16 sps:$4 sm:$0xff]  }
 0x8ac   : > { %3242 = vmatprep.subr.bf16.mxu0 %v4831_v9 }
 0x8af   : > { %3243 = vmatpush1.bf16.msra.mxu0 %v4829_v27 }
 0x8b0   : > { %3244 = vmatprep.subr.bf16.mxu0 %v4834_v60 }
 0x8b3   : > { %3245 = vmatpush1.bf16.msra.mxu0 %v4832_v15 }
 0x8b4   : > { %3246 = vmatprep.subr.bf16.mxu0 %v4837_v16  ;;  %v3102_v16 = vrot.slane %v4201_v0, %v5231_v13 }
 0x8b7   : > { %3247 = vmatpush1.bf16.msra.mxu0 %v4835_v10  ;;  %v3106_v10 = vrot.slane %v4201_v0, %v5234_v14 }
 0x8b8   : > { %4500 = vmatprep.subr.bf16.mxu0 %v4854_v37 }
 0x8ba   : > { %4219 = vmatmul.mubr.msk.bf16.vlgmr.msra.gmra.mxu0 %vm749_vm2, %v5397_v62  ;;  %v4846_v62 = vld [vmem:[%s6071_s10 + $0x358] sm:$0xff]  }
 0x8bb   : > { %4486 = vmatprep.subr.bf16.mxu1 %v4846_v62  ;;  %4501 = vmatpush3.bf16.msra.mxu0 %v4855_v44 }
 0x8bc   : > { %4487 = vmatpush3.bf16.msra.mxu1 %v4847_v25  ;;  %4502 = vmatprep.subr.bf16.mxu0 %v4856_v39 }
 0x8bd   : > { %4488 = vmatprep.subr.bf16.mxu1 %v4848_v26 }
 0x8bf   : > { %4503 = vmatpush3.bf16.msra.mxu0 %v4857_v7 }
 0x8c0   : > { %4489 = vmatpush3.bf16.msra.mxu1 %v4849_v28  ;;  %4504 = vmatprep.subr.bf16.mxu0 %v4858_v42 }
 0x8c1   : > { %4490 = vmatprep.subr.bf16.mxu1 %v4850_v29 }
 0x8c3   : > { %4505 = vmatpush3.bf16.msra.mxu0 %v4859_v46  ;;  %v4896_v46 = vld [vmem:[%s6073_s12] sm:$0xff] }
 0x8c4   : > { %4491 = vmatpush3.bf16.msra.mxu1 %v4851_v35  ;;  %4506 = vmatprep.subr.bf16.mxu0 %v4860_v47  ;;  %v3622_v47 = vrot.slane %v4896_v46, %v5240_v20  ;;  %v4871_v20 = vld [vmem:[%s6072_s11 + $0x10] sm:$0xff]  }
 0x8c5   : > { %4492 = vmatprep.subr.bf16.mxu1 %v4852_v36 }
 0x8c7   : > { %4507 = vmatpush3.bf16.msra.mxu0 %v4861_v40 }
 0x8c8   : > { %4493 = vmatpush3.bf16.msra.mxu1 %v4853_v30  ;;  %4508 = vmatprep.subr.bf16.mxu0 %v4862_v48 }
 0x8c9   : > { %4575 = vmatprep.subr.bf16.mxu1 %v4959_v1 }
 0x8cb   : > { %4509 = vmatpush3.bf16.msra.mxu0 %v4863_v49 }
 0x8cc   : > { %4510 = vmatprep.subr.bf16.mxu0 %v4864_v33 }
 0x8cf   : > { %4511 = vmatpush3.bf16.msra.mxu0 %v4865_v12 }
 0x8d0   : > { %4512 = vmatprep.subr.bf16.mxu0 %v4866_v32 }
 0x8d3   : > { %4513 = vmatpush3.bf16.msra.mxu0 %v4867_v52 }
 0x8d4   : > { %4514 = vmatprep.subr.bf16.mxu0 %v4868_v53 }
 0x8d7   : > { %4515 = vmatpush3.bf16.msra.mxu0 %v4869_v34 }
 0x94b   : > { %v4450_v61 = vpop.f32.mrf.mxu1 }
 0x94d   : > { %v4451_v63 = vpop.f32.mrf.mxu1 }
 0x94e   : > { %v4452_v51 = vadd.f32 %v4451_v63, %v4450_v61  ;;  %v4870_v63 = vld [vmem:[%s6072_s11 + $0x18] sm:$0xff]  }
 0x94f   : > { %v4453_v17 = vpop.f32.mrf.mxu1 }
 0x951   : > { %v4454_v54 = vpop.f32.mrf.mxu1 }
 0x95b   : > { %v3225_v58 = vpop.f32.mrf.mxu1 }
 0x95c   : > { %v3226_v22 = vadd.f32 %v3225_v58, %v3094_v55  ;;  %v3641_v55 = vrot.slane %v4896_v46, %v5244_v31 }
 0x95d   : > { %v3227_v59 = vpop.f32.mrf.mxu1 }
 0x95e   : > { %v3228_v2 = vadd.f32 %v3227_v59, %v3098_v57  ;;  %v3273_v3 = vmax.f32 %v3226_v22, 0.0  ;;  %v3646_v22 = vrot.slane %v4896_v46, %v5248_v41 }
 0x95f   : > { %v3229_v4 = vpop.f32.mrf.mxu1 }
 0x960   : > { %v3274_v23 = vmax.f32 %v3228_v2, 0.0  ;;  %v3277_v8 = vpack.c.bf16 %v3273_v3, %v3273_v3 }
 0x961   : > { %v3230_v5 = vpop.f32.mrf.mxu1 }
 0x962   : > { %v3278_v6 = vpack.c.bf16 %v3274_v23, %v3274_v23 }
 0x964   : > { %3570 = vmatprep.mubr.bf16.mxu1 %v3278_v6 }
 0x965   : > { %3571 = vmatmul.mubr.bf16.vlgmr.msra.gmra.mxu1 %v3277_v8 }
 0x966   : > { %4583 = vmatprep.mubr.msk.bf16.mxu1 %vm4960_vm0, %v4959_v1  ;;  %4576 = vmatpush3.bf16.msra.mxu1 %v4870_v63 }
 0x967   : > { %4577 = vmatprep.subr.bf16.mxu1 %v4959_v1 }
 0x96a   : > { %v4472_v56 = vpop.f32.mrf.mxu0  ;;  %4578 = vmatpush3.bf16.msra.mxu1 %v4871_v20 }
 0x96b   : > { %4579 = vmatprep.subr.bf16.mxu1 %v4959_v1 }
 0x96c   : > { %v4473_v9 = vpop.f32.mrf.mxu0 }
 0x96d   : > { %v4474_v38 = vadd.f32 %v4473_v9, %v4472_v56 }
 0x96e   : > { %v4475_v27 = vpop.f32.mrf.mxu0 }
 0x96f   : > { %v3065_v11 = vadd.f32 %v4474_v38, %v4452_v51  ;;  %v4873_v51 = vld [vmem:[%s6072_s11] sm:$0xff]  }
 0x970   : > { %v4476_v60 = vpop.f32.mrf.mxu0 }
 0x971   : > { %v3070_v15 = vadd.f32 %v3065_v11, %v5852_v50 }
 0x97a   : > { %v3266_v18 = vpop.f32.mrf.mxu0 }
 0x97b   : > { %v3267_v19 = vadd.f32 %v3266_v18, %v3102_v16 }
 0x97c   : > { %v3268_v21 = vpop.f32.mrf.mxu0 }
 0x97d   : > { %v3269_v24 = vadd.f32 %v3268_v21, %v3106_v10  ;;  %v3275_v62 = vmax.f32 %v3267_v19, 0.0 }
 0x97e   : > { %v3270_v25 = vpop.f32.mrf.mxu0 }
 0x97f   : > { %v3276_v26 = vmax.f32 %v3269_v24, 0.0  ;;  %v3279_v35 = vpack.c.bf16 %v3275_v62, %v3275_v62 }
 0x980   : > { %v3271_v28 = vpop.f32.mrf.mxu0 }
 0x981   : > { %v3280_v29 = vpack.c.bf16 %v3276_v26, %v3276_v26 }
 0x983   : > { %3610 = vmatprep.mubr.bf16.mxu0 %v3280_v29 }
 0x984   : > { %3611 = vmatmul.mubr.bf16.vlgmr.msra.gmra.mxu0 %v3279_v35 }
 0xa25   : > { %v4494_v36 = vpop.f32.mrf.mxu1 }
 0xa27   : > { %v4495_v30 = vpop.f32.mrf.mxu1 }
 0xa28   : > { %v4496_v39 = vadd.f32 %v4495_v30, %v4494_v36 }
 0xa29   : > { %v4497_v37 = vpop.f32.mrf.mxu1 }
 0xa2b   : > { %v4498_v50 = vpop.f32.mrf.mxu1 }
 0xa44   : > { %v4516_v44 = vpop.f32.mrf.mxu0 }
 0xa46   : > { %v4517_v13 = vpop.f32.mrf.mxu0 }
 0xa47   : > { %v4518_v14 = vadd.f32 %v4517_v13, %v4516_v44 }
 0xa48   : > { %v4519_v7 = vpop.f32.mrf.mxu0 }
 0xa49   : > { %v3613_v42 = vadd.f32 %v4518_v14, %v4496_v39 }
 0xa4a   : > { %v4520_v40 = vpop.f32.mrf.mxu0 }
 0xa4b   : > { %v3618_v48 = vadd.f32 %v3613_v42, %v3070_v15 }
 0xa4d   : > { %v3623_v49 = vadd.f32 %v3622_v47, %v3618_v48 }
 0xa4f   : > { %v3624_v33 = vadd.f32 %v3623_v49, %v5390_v45  ;;  %v4872_v45 = vld [vmem:[%s6072_s11 + $0x8] sm:$0xff]  }
 0xa50   : > { %4580 = vmatpush3.bf16.msra.mxu1 %v4872_v45 }
 0xa51   : > { %v3625_v12 = vsel %vm749_vm2, %v3624_v33, 0.0  ;;  %4581 = vmatprep.subr.bf16.mxu1 %v4959_v1  ;;  %v3660_v1 = vrot.slane %v4896_v46, %v5252_v43 }
 0xa52   : > { %3626 = vadd.xlane.f32.xlu1 %v3625_v12 }
 0xa54   : > { %4582 = vmatpush3.bf16.msra.mxu1 %v4873_v51 }
 0xadb   : > { %v3627_v32 = vpop.xlane.xlu1 %3626 }
 0xadc   : > { %v3628_v52 = vmul.f32 0.015625, %v3627_v32 }
 0xade   : > { %v3629_v53 = vsub.f32 %v3624_v33, %v3628_v52 }
 0xae0   : > { %v3630_v34 = vmul.f32 %v3629_v53, %v3629_v53 }
 0xae2   : > { %v3631_v61 = vsel %vm749_vm2, %v3630_v34, 0.0 }
 0xae3   : > { %3632 = vadd.xlane.f32.xlu1 %v3631_v61 }
 0xb6c   : > { %v3633_v17 = vpop.xlane.xlu1 %3632 }
 0xb6d   : > { %v3634_v54 = vmul.f32 0.015625, %v3633_v17 }
 0xb6f   : > { %v3635_v0 = vadd.f32 1e-05, %v3634_v54 }
 0xb71   : > { %4894 = vrsqrt.f32 %v3635_v0 }
 0xb7e   : > { %v4895_v57 = vpop.eup %4894 }
 0xb7f   : > { %v3637_v58 = vmul.f32 %v4895_v57, %v3629_v53 }
 0xb81   : > { %v3642_v59 = vmul.f32 %v3641_v55, %v3637_v58 }
 0xb83   : > { %v3647_v2 = vadd.f32 %v3646_v22, %v3642_v59 }
 0xb85   : > { %v3648_v3 = vpack.c.bf16 %v3647_v2, %v3647_v2 }
 0xb87   : > { %4584 = vmatmul.mubr.msk.bf16.vlgmr.msra.gmra.mxu1 %vm749_vm2, %v3648_v3 }
 0xc47   : > { %v3722_v4 = vpop.f32.mrf.mxu1 }
 0xc48   : > { %v3723_v23 = vadd.f32 %v3722_v4, %v3660_v1 }
 0xc49   : > { %v4585_v31 = vpop.f32.mrf.mxu1 }
 0xc4a   : > { %3728 = vst [vmem:[%s474_s17] sm:$0xff] %v3723_v23 }
 0xc4b   : > { %v3725_v41 = vpop.f32.mrf.mxu1 }
 0xc4c   : > { %4910 = shalt.err (!%p4907_p4)
}
 0xc4d   : > { %s4911_s27 = scalar_lea.hbm %s6020_s22, 128  ;;  %s4915_s17 = scalar_lea.hbm %s6074_s13, 256 }
 0xc4e   : > { %p4912_p7 = scmp.ne.s32.totalorder %s6020_s22, %s4911_s27  ;;  %p4916_p10 = scmp.lt.s32.totalorder %s6020_s22, %s6074_s13 }
 0xc4f   : > { %p4917_p11 = scmp.lt.s32.totalorder %s4915_s17, %s4911_s27 }
 0xc50   : > { %p4913_p8 = pnand %p4912_p7, %p5072_p5 }
 0xc51   : > { %p4918_p12 = por %p4917_p11, %p4916_p10 }
 0xc52   : > { %p4914_p9 = pneg %p4913_p8 }
 0xc54   : > { %p4919_p13 = pnand %p4918_p12, %p4914_p9 }
 0xc56   : > { %4922 = shalt.err (!%p4919_p13)
}
 0xc57   : > { %4587 = dma.vmem_to_hbm [thread:$0]  (%p5072_p5), %s6022_s5, 128, %s6020_s22, %s3730_s23   ;;  %v4586_v43 = vpop.f32.mrf.mxu1 }
 0xc58 PF: > { %p4593_p0 = scmp.ge.s32.totalorder %s4957_s28, 2  ;;  %s3755_s30 = sand.u32 1, %s4945_s25  }
 0xc59   : > { %s3756_s29 = scalar_lea.sflag [#allocation3], %s3755_s30 }
 0xc5a   : > { %p4590_p1 = pnand %p4593_p0, %p5076_p6 }
 0xc5c   : > { %p4591_p2 = pneg %p4590_p1 }
 0xc5e   : > { %4940 = dma.done.wait (%p4591_p2), %s3756_s29, 128  }
 0xc5f   : > { %4942 = vsyncadd (%p4591_p2), %s3756_s29, 4294967168  ;;  %s6084_s15 = sld [smem:[#allocation5_spill]]  ;;  %p23_p3 = scmp.ge.s32.totalorder %s5059_s14, 4  }
 0xc60   : > { %s6085_s27 = sld [smem:[#allocation6_spill]]  ;;  %s6086_s25 = smov %s4949_s26 }
 0xc61   : > { %s6088_s28 = smov %s5059_s14  ;;  %25 = sbr.rel (!%p23_p3) target bundleno = 6 (0x6), region = 125 }
 0xc65   : > { %s6087_s26 = smov %s6084_s15 }
 0xc66   :  { %3761 = vsyncpa [#allocation3], 1 }
 0xc67   :  { %3763 = vsyncpa [#allocation3 + $0x1], 1 }

</bundles_post_ra>
